<compile_context>
chip_gen: v7x
topology: tpu7x:2x2x1
jax: 0.10.0
libtpu: 0.0.40
codegen_flags: <defaults>
</compile_context>

<pallas_src>
import jax
import jax.numpy as jnp
from jax.experimental import pallas as pl
from jax.experimental.pallas import tpu as pltpu

IN_FEATURES = 3 * 32 * 32    # 3072  (K)
OUT_FEATURES = 10            # true N
OUT_PAD = 128                # lane-dense padded N


def _round_up(n, m):
    return ((n + m - 1) // m) * m


def fc_kernel(x_ref, w_ref, b_ref, o_ref):
    # One un-tiled-K matmul per batch tile; bias added in f32, cast on store.
    o_ref[...] = (
        jnp.dot(x_ref[...], w_ref[...], preferred_element_type=jnp.float32)
        + b_ref[...]
    ).astype(o_ref.dtype)


def prepare_fc_params(w, b):
    """One-time (init-time) param prep.

    w: (10, 3072) torch-layout weight, b: (10,) bias.
    Returns (w_pad, b_pad) with shapes (3072, 128) and (1, 128).
    """
    w_pad = jnp.pad(w.T, ((0, 0), (0, OUT_PAD - OUT_FEATURES)))
    b_pad = jnp.pad(b.reshape(1, OUT_FEATURES),
                    ((0, 0), (0, OUT_PAD - OUT_FEATURES)))
    return w_pad, b_pad


def fc_forward(x, w_pad, b_pad, *, tm=1024, trim=True):
    """x: (B, 3, 32, 32) f32; w_pad: (3072, 128); b_pad: (1, 128) -> (B, 10).

    With trim=False returns the (B, 128) lane-padded result (cols 10..127 are
    exactly zero-weight + zero-bias columns), avoiding the lane-narrow copy.
    """
    B = x.shape[0]
    x2d = x.reshape(B, IN_FEATURES)          # same semantics as torch .view

    # Pad rows only to a multiple of 8 sublanes (<=7 extra rows).
    b_rows = _round_up(max(B, 1), 8)
    if b_rows != B:
        x2d = jnp.pad(x2d, ((0, b_rows - B), (0, 0)))

    # Batch (M) tile: multiple of 8, capped at `tm` (rounded to 8).
    cap = _round_up(max(8, min(tm, b_rows)), 8)
    if b_rows > cap:
        tile_m = cap                                   # grid >= 2 automatically
    elif b_rows >= 16:
        tile_m = _round_up(pl.cdiv(b_rows, 2), 8)      # force >=2 grid steps
    else:
        tile_m = b_rows                                # tiny batch: one step
    grid_m = pl.cdiv(b_rows, tile_m)

    cost = pl.CostEstimate(
        flops=2 * b_rows * IN_FEATURES * OUT_PAD,
        transcendentals=0,
        bytes_accessed=(b_rows * IN_FEATURES * 4      # stream x
                        + IN_FEATURES * OUT_PAD * 4   # weight (fetched once)
                        + b_rows * OUT_PAD * 4),      # output write
    )

    out = pl.pallas_call(
        fc_kernel,
        out_shape=jax.ShapeDtypeStruct((b_rows, OUT_PAD), x.dtype),
        grid_spec=pltpu.PrefetchScalarGridSpec(
            num_scalar_prefetch=0,
            grid=(grid_m,),
            in_specs=[
                # (tile_m, 3072) slab of the flattened input, streamed over M.
                pl.BlockSpec((tile_m, IN_FEATURES), lambda i: (i, 0)),
                # Full padded weight; constant block index => fetched once.
                pl.BlockSpec((IN_FEATURES, OUT_PAD), lambda i: (0, 0)),
                # Full padded bias; constant block index => fetched once.
                pl.BlockSpec((1, OUT_PAD), lambda i: (0, 0)),
            ],
            out_specs=pl.BlockSpec((tile_m, OUT_PAD), lambda i: (i, 0)),
        ),
        compiler_params=pltpu.CompilerParams(
            dimension_semantics=("parallel",),
            vmem_limit_bytes=48 << 20,   # fits tm=1024 double-buffered on v5e/v6e/v7x
        ),
        cost_estimate=cost,
    )(x2d, w_pad, b_pad)

    if trim:
        return out[:B, :OUT_FEATURES]
    return out[:B]


if __name__ == "__main__":
    key = jax.random.PRNGKey(0)
    kx, kw, kb, kx2 = jax.random.split(key, 4)

    # Deterministic init mimicking nn.Linear default U(-1/sqrt(in), 1/sqrt(in)).
    bound = 1.0 / (IN_FEATURES ** 0.5)
    w = jax.random.uniform(kw, (OUT_FEATURES, IN_FEATURES), jnp.float32,
                           minval=-bound, maxval=bound)
    b = jax.random.uniform(kb, (OUT_FEATURES,), jnp.float32,
                           minval=-bound, maxval=bound)
    w_pad, b_pad = prepare_fc_params(w, b)   # one-time padding at "module init"

    # Small-batch NCHW input consistent with the module's expected flatten size.
    x = jax.random.normal(kx, (2, 3, 32, 32), jnp.float32)
    out = jax.block_until_ready(fc_forward(x, w_pad, b_pad))
    ref = x.reshape(2, IN_FEATURES) @ w.T + b
    assert out.shape == (2, OUT_FEATURES)
    assert jnp.allclose(out, ref, atol=1e-4, rtol=1e-4)

    # Second check: non-multiple-of-8 batch exercises the row pad + 2-step grid.
    x2 = jax.random.normal(kx2, (9, 3, 32, 32), jnp.float32)
    out2 = jax.block_until_ready(fc_forward(x2, w_pad, b_pad))
    ref2 = x2.reshape(9, IN_FEATURES) @ w.T + b
    assert out2.shape == (9, OUT_FEATURES)
    assert jnp.allclose(out2, ref2, atol=1e-4, rtol=1e-4)

    print("KERNEL_OK")
</pallas_src>

<mosaic_0001>
module attributes {stable_mosaic.version = 11 : i64} {
  func.func @fc_kernel(%arg0: i32, %arg1: memref<8x3072xf32, #tpu.memory_space<vmem>>, %arg2: memref<3072x128xf32, #tpu.memory_space<vmem>>, %arg3: memref<1x128xf32, #tpu.memory_space<vmem>>, %arg4: memref<8x128xf32, #tpu.memory_space<vmem>>) attributes {dimension_semantics = [#tpu.dimension_semantics<parallel>], iteration_bounds = array<i64: 1>, scalar_prefetch = 0 : i64, scratch_operands = 0 : i64, tpu.core_type = #tpu.core_type<tc>, window_params = [{transform_indices = @transform_0, window_bounds = array<i64: 8, 3072>}, {pipeline_mode = #tpu.pipeline_mode<synchronous>, transform_indices = @transform_1, window_bounds = array<i64: 3072, 128>}, {pipeline_mode = #tpu.pipeline_mode<synchronous>, transform_indices = @transform_2, window_bounds = array<i64: 1, 128>}, {transform_indices = @transform_3, window_bounds = array<i64: 8, 128>}]} {
    %c0 = arith.constant 0 : index
    %c0_0 = arith.constant 0 : index
    %0 = vector.load %arg1[%c0, %c0_0] : memref<8x3072xf32, #tpu.memory_space<vmem>>, vector<8x3072xf32>
    %c0_1 = arith.constant 0 : index
    %c0_2 = arith.constant 0 : index
    %1 = vector.load %arg2[%c0_1, %c0_2] : memref<3072x128xf32, #tpu.memory_space<vmem>>, vector<3072x128xf32>
    %cst = arith.constant dense<0.000000e+00> : vector<8x128xf32>
    %2 = tpu.matmul %0, %1, %cst {dimension_numbers = #tpu.dot_dimension_numbers<[1], [0], [0], [1], [0, 0, 1, 1], [], []>} : vector<8x3072xf32>, vector<3072x128xf32>, vector<8x128xf32> -> vector<8x128xf32>
    %c0_3 = arith.constant 0 : index
    %c0_4 = arith.constant 0 : index
    %3 = vector.load %arg3[%c0_3, %c0_4] : memref<1x128xf32, #tpu.memory_space<vmem>>, vector<1x128xf32>
    %4 = vector.broadcast %3 : vector<1x128xf32> to vector<8x128xf32>
    %5 = arith.addf %2, %4 : vector<8x128xf32>
    %c0_5 = arith.constant 0 : index
    %c0_6 = arith.constant 0 : index
    %6 = vector.load %arg4[%c0_5, %c0_6] : memref<8x128xf32, #tpu.memory_space<vmem>>, vector<8x128xf32>
    tpu.vector_store %arg4[%c0_5, %c0_6], %5 {strides = array<i32>} : memref<8x128xf32, #tpu.memory_space<vmem>>, vector<8x128xf32>,
    return
  }
  func.func @transform_0(%arg0: i32) -> (i32, i32) {
    %c0_i32 = arith.constant 0 : i32
    %c0_i32_0 = arith.constant 0 : i32
    return %arg0, %c0_i32 : i32, i32
  }
  func.func @transform_1(%arg0: i32) -> (i32, i32) {
    %c0_i32 = arith.constant 0 : i32
    %c0_i32_0 = arith.constant 0 : i32
    %c0_i32_1 = arith.constant 0 : i32
    return %c0_i32, %c0_i32_0 : i32, i32
  }
  func.func @transform_2(%arg0: i32) -> (i32, i32) {
    %c0_i32 = arith.constant 0 : i32
    %c0_i32_0 = arith.constant 0 : i32
    %c0_i32_1 = arith.constant 0 : i32
    return %c0_i32, %c0_i32_0 : i32, i32
  }
  func.func @transform_3(%arg0: i32) -> (i32, i32) {
    %c0_i32 = arith.constant 0 : i32
    %c0_i32_0 = arith.constant 0 : i32
    return %arg0, %c0_i32 : i32, i32
  }
}

</mosaic_0001>

<bundles_post_ra>
// kernel: tpu_custom_call.1
= control target key start
LH: loop header
LB: loop body
LE: loop exit
PB: predicated region body
PF: predicated region fallthrough
CT: control target
= control target key end

     0   :  { %8 = vsyncpa [#allocation3], 0  ;;  %s2303_s0 = inlined_call_operand.hbm [shape: f32[8,3072], index: 0, kind: input, shape index: {}]   ;;  %s2304_s1 = inlined_call_operand.hbm [shape: f32[3072,128], index: 1, kind: input, shape index: {}]   ;;  %s2305_s2 = inlined_call_operand.hbm [shape: f32[1,128], index: 2, kind: input, shape index: {}]   ;;  %s2306_s3 = inlined_call_operand.hbm [shape: f32[8,128], index: 3, kind: output, shape index: {}]  }
   0x1   :  { %9 = vsyncpa [#allocation6], 0 }
   0x2   :  { %10 = vsyncpa [#allocation4], 0  ;;  %s2229_s12 = smov [#allocation5]   ;;  %s2135_s16 = scalar_lea.hbm %s2304_s1, 49152 }
   0x3   :  { %s26_s13 = sshll.u32 %s2229_s12, 4  ;;  %p2136_p0 = scmp.ne.s32.totalorder %s2304_s1, %s2135_s16  ;;  %s27_s13 = int_to_ptr.vmem [resolvable:$true] %s26_s13 }
   0x4   :  { %p2139_p1 = scmp.lt.u32.totalorder %s2135_s16, %s2304_s1 }
   0x6   :  { %p2141_p2 = pnand %p2139_p1, %p2136_p0 }
   0x8   :  { %2144 = shalt.err (!%p2141_p2)
}
   0x9   :  { %s2145_s21 = scalar_lea.vmem %s27_s13, 49152  ;;  %p2150_p4 = scmp.lt.s32.totalorder %s27_s13, %s27_s13 }
   0xa   :  { %p2146_p3 = scmp.ne.s32.totalorder %s27_s13, %s2145_s21  ;;  %p2151_p5 = scmp.lt.s32.totalorder %s2145_s21, %s2145_s21 }
   0xc   :  { %p2152_p6 = por %p2151_p5, %p2150_p4 }
   0xe   :  { %p2153_p7 = pnand %p2152_p6, %p2146_p3 }
  0x10   :  { %2156 = shalt.err (!%p2153_p7)
}
  0x11   :  { %s2230_s22 = smov 128   ;;  %s2231_s23 = smov 8  }
  0x12   :  { %32 = dma.hbm_to_vmem [thread:$0]  %s2304_s1, 49152, %s27_s13, [#allocation6], %s2230_s22, %s2230_s22, %s2231_s23  }
  0x13   :  { %s2232_s26 = smov [#allocation2]   ;;  %s2233_s28 = smov [#allocation7]  }
  0x14   :  { %s17_s27 = sshll.u32 %s2232_s26, 4  ;;  %s39_s29 = sshll.u32 %s2233_s28, 4  ;;  %s18_s27 = int_to_ptr.vmem [resolvable:$true] %s17_s27  ;;  %s40_s29 = int_to_ptr.vmem [resolvable:$true] %s39_s29 }
  0x15   :  { %s2157_s5 = scalar_lea.hbm %s2303_s0, 3072 }
  0x16   :  { %p2158_p8 = scmp.ne.s32.totalorder %s2303_s0, %s2157_s5  ;;  %p2161_p9 = scmp.lt.u32.totalorder %s2157_s5, %s2303_s0 }
  0x18   :  { %p2163_p10 = pnand %p2161_p9, %p2158_p8 }
  0x1a   :  { %2166 = shalt.err (!%p2163_p10)
}
  0x1b   :  { %s2167_s1 = scalar_lea.vmem %s18_s27, 3072  ;;  %p2172_p12 = scmp.lt.s32.totalorder %s18_s27, %s18_s27 }
  0x1c   :  { %p2168_p11 = scmp.ne.s32.totalorder %s18_s27, %s2167_s1  ;;  %p2173_p13 = scmp.lt.s32.totalorder %s2167_s1, %s2167_s1 }
  0x1e   :  { %p2174_p0 = por %p2173_p13, %p2172_p12 }
  0x20   :  { %p2175_p1 = pnand %p2174_p0, %p2168_p11 }
  0x22   :  { %2178 = shalt.err (!%p2175_p1)
}
  0x23   :  { %20 = dma.hbm_to_vmem [thread:$0]  %s2303_s0, 3072, %s18_s27, [#allocation3]  }
  0x24   :  { %s2179_s14 = scalar_lea.hbm %s2305_s2, 16 }
  0x25   :  { %p2180_p2 = scmp.ne.s32.totalorder %s2305_s2, %s2179_s14  ;;  %p2183_p3 = scmp.lt.u32.totalorder %s2179_s14, %s2305_s2 }
  0x27   :  { %p2185_p4 = pnand %p2183_p3, %p2180_p2 }
  0x29   :  { %2188 = shalt.err (!%p2185_p4)
}
  0x2a   :  { %s2189_s19 = scalar_lea.vmem %s40_s29, 16  ;;  %s2193_s20 = scalar_lea.vmem %s40_s29, 32 }
  0x2b   :  { %p2190_p5 = scmp.ne.s32.totalorder %s40_s29, %s2189_s19  ;;  %p2194_p6 = scmp.lt.s32.totalorder %s40_s29, %s40_s29 }
  0x2c   :  { %p2195_p7 = scmp.lt.s32.totalorder %s2193_s20, %s2189_s19 }
  0x2e   :  { %p2196_p8 = por %p2195_p7, %p2194_p6 }
  0x30   :  { %p2197_p9 = pnand %p2196_p8, %p2190_p5 }
  0x32   :  { %2200 = shalt.err (!%p2197_p9)
}
  0x33   :  { %42 = dma.hbm_to_vmem [thread:$0]  %s2305_s2, 16, %s40_s29, [#allocation6]  }
  0x34   :  { %2223 = dma.done.wait [#allocation3], 3072  }
  0x35   :  { %2224 = vsyncadd [#allocation3], 4294964224 }
  0x36   :  { %2225 = dma.done.wait [#allocation6], 49168  }
  0x37   :  { %2226 = vsyncadd [#allocation6], 4294918128  ;;  %v92_v0 = vld [vmem:[#allocation5 + $0x80] sm:$0xff]  ;;  %v93_v1 = vld [vmem:[#allocation5 + $0x88] sm:$0xff]  ;;  %s2234_s2 = smov [#allocation8]  }
  0x38   :  { %v76_v2 = vld [vmem:[#allocation5] sm:$0xff]  ;;  %v1745_v3 = vpack.c.bf16 %v93_v1, %v92_v0  ;;  %v77_v4 = vld [vmem:[#allocation5 + $0x8] sm:$0xff]  ;;  %v94_v11 = vld [vmem:[#allocation5 + $0x90] sm:$0xff]  ;;  %s1314_s22 = sshll.u32 %s2234_s2, 4  ;;  %s1315_s22 = int_to_ptr.vmem [resolvable:$true] %s1314_s22 }
  0x39   :  { %v124_v5 = vld [vmem:[#allocation5 + $0x180] sm:$0xff]  ;;  %v125_v6 = vld [vmem:[#allocation5 + $0x188] sm:$0xff]  ;;  %v1747_v7 = vpack.c.bf16 %v77_v4, %v76_v2  ;;  %v95_v13 = vld [vmem:[#allocation5 + $0x98] sm:$0xff]  ;;  %s2201_s23 = scalar_lea.vmem %s1315_s22, 128  ;;  %p2206_p11 = scmp.lt.s32.totalorder %s1315_s22, %s1315_s22 }
  0x3a   :  { %v1777_v8 = vpack.c.bf16 %v125_v6, %v124_v5  ;;  %v108_v9 = vld [vmem:[#allocation5 + $0x100] sm:$0xff]  ;;  %v109_v10 = vld [vmem:[#allocation5 + $0x108] sm:$0xff]  ;;  %1746 = vmatprep.subr.bf16.mxu0 %v1745_v3  ;;  %v78_v14 = vld [vmem:[#allocation5 + $0x10] sm:$0xff]  ;;  %v1749_v16 = vpack.c.bf16 %v95_v13, %v94_v11  ;;  %p2202_p10 = scmp.ne.s32.totalorder %s1315_s22, %s2201_s23  ;;  %p2207_p12 = scmp.lt.s32.totalorder %s2201_s23, %s2201_s23 }
  0x3b   :  { %v1779_v12 = vpack.c.bf16 %v109_v10, %v108_v9  ;;  %v79_v15 = vld [vmem:[#allocation5 + $0x18] sm:$0xff]  ;;  %1748 = vmatpush3.bf16.msra.mxu0 %v1747_v7  ;;  %v126_v18 = vld [vmem:[#allocation5 + $0x190] sm:$0xff]  ;;  %v96_v23 = vld [vmem:[#allocation5 + $0xa0] sm:$0xff] }
  0x3c   :  { %1778 = vmatprep.subr.bf16.mxu1 %v1777_v8  ;;  %v1751_v17 = vpack.c.bf16 %v79_v15, %v78_v14  ;;  %v127_v19 = vld [vmem:[#allocation5 + $0x198] sm:$0xff]  ;;  %v110_v20 = vld [vmem:[#allocation5 + $0x110] sm:$0xff]  ;;  %v97_v24 = vld [vmem:[#allocation5 + $0xa8] sm:$0xff]  ;;  %1750 = vmatprep.subr.bf16.mxu0 %v1749_v16  ;;  %p2208_p13 = por %p2207_p12, %p2206_p11 }
  0x3d   :  { %1780 = vmatpush3.bf16.msra.mxu1 %v1779_v12  ;;  %v1781_v21 = vpack.c.bf16 %v127_v19, %v126_v18  ;;  %v111_v22 = vld [vmem:[#allocation5 + $0x118] sm:$0xff]  ;;  %v1753_v26 = vpack.c.bf16 %v97_v24, %v96_v23  ;;  %v80_v27 = vld [vmem:[#allocation5 + $0x20] sm:$0xff]  ;;  %v81_v28 = vld [vmem:[#allocation5 + $0x28] sm:$0xff] }
  0x3e   :  { %v1783_v25 = vpack.c.bf16 %v111_v22, %v110_v20  ;;  %v128_v29 = vld [vmem:[#allocation5 + $0x1a0] sm:$0xff]  ;;  %v129_v30 = vld [vmem:[#allocation5 + $0x1a8] sm:$0xff]  ;;  %v1755_v33 = vpack.c.bf16 %v81_v28, %v80_v27  ;;  %v98_v35 = vld [vmem:[#allocation5 + $0xb0] sm:$0xff]  ;;  %p2209_p0 = pnand %p2208_p13, %p2202_p10 }
  0x3f   :  { %1782 = vmatprep.subr.bf16.mxu1 %v1781_v21  ;;  %v112_v31 = vld [vmem:[#allocation5 + $0x120] sm:$0xff]  ;;  %v113_v32 = vld [vmem:[#allocation5 + $0x128] sm:$0xff]  ;;  %1752 = vmatpush3.bf16.msra.mxu0 %v1751_v17  ;;  %v1785_v34 = vpack.c.bf16 %v129_v30, %v128_v29  ;;  %v99_v36 = vld [vmem:[#allocation5 + $0xb8] sm:$0xff] }
  0x40   :  { %v82_v37 = vld [vmem:[#allocation5 + $0x30] sm:$0xff]  ;;  %1754 = vmatprep.subr.bf16.mxu0 %v1753_v26  ;;  %v1787_v38 = vpack.c.bf16 %v113_v32, %v112_v31  ;;  %v1757_v39 = vpack.c.bf16 %v99_v36, %v98_v35  ;;  %v83_v40 = vld [vmem:[#allocation5 + $0x38] sm:$0xff]  ;;  %v100_v46 = vld [vmem:[#allocation5 + $0xc0] sm:$0xff] }
  0x41   :  { %1784 = vmatpush3.bf16.msra.mxu1 %v1783_v25  ;;  %v130_v41 = vld [vmem:[#allocation5 + $0x1b0] sm:$0xff]  ;;  %v131_v42 = vld [vmem:[#allocation5 + $0x1b8] sm:$0xff]  ;;  %v101_v47 = vld [vmem:[#allocation5 + $0xc8] sm:$0xff]  ;;  %v1759_v48 = vpack.c.bf16 %v83_v40, %v82_v37 }
  0x42   :  { %1786 = vmatprep.subr.bf16.mxu1 %v1785_v34  ;;  %v1789_v43 = vpack.c.bf16 %v131_v42, %v130_v41  ;;  %v114_v44 = vld [vmem:[#allocation5 + $0x130] sm:$0xff]  ;;  %v115_v45 = vld [vmem:[#allocation5 + $0x138] sm:$0xff]  ;;  %v132_v49 = vld [vmem:[#allocation5 + $0x1c0] sm:$0xff]  ;;  %v1761_v52 = vpack.c.bf16 %v101_v47, %v100_v46 }
  0x43   :  { %1756 = vmatpush3.bf16.msra.mxu0 %v1755_v33  ;;  %v133_v50 = vld [vmem:[#allocation5 + $0x1c8] sm:$0xff]  ;;  %v1791_v51 = vpack.c.bf16 %v115_v45, %v114_v44  ;;  %v84_v53 = vld [vmem:[#allocation5 + $0x40] sm:$0xff]  ;;  %v102_v58 = vld [vmem:[#allocation5 + $0xd0] sm:$0xff] }
  0x44   :  { %1758 = vmatprep.subr.bf16.mxu0 %v1757_v39  ;;  %v85_v54 = vld [vmem:[#allocation5 + $0x48] sm:$0xff]  ;;  %v116_v55 = vld [vmem:[#allocation5 + $0x140] sm:$0xff]  ;;  %v1793_v56 = vpack.c.bf16 %v133_v50, %v132_v49  ;;  %v103_v59 = vld [vmem:[#allocation5 + $0xd8] sm:$0xff] }
  0x45   :  { %1788 = vmatpush3.bf16.msra.mxu1 %v1787_v38  ;;  %v117_v57 = vld [vmem:[#allocation5 + $0x148] sm:$0xff]  ;;  %v134_v60 = vld [vmem:[#allocation5 + $0x1d0] sm:$0xff]  ;;  %v135_v61 = vld [vmem:[#allocation5 + $0x1d8] sm:$0xff]  ;;  %v1763_v62 = vpack.c.bf16 %v85_v54, %v84_v53  ;;  %v1765_v0 = vpack.c.bf16 %v103_v59, %v102_v58 }
  0x46   :  { %1790 = vmatprep.subr.bf16.mxu1 %v1789_v43  ;;  %v1795_v63 = vpack.c.bf16 %v117_v57, %v116_v55  ;;  %v86_v1 = vld [vmem:[#allocation5 + $0x50] sm:$0xff]  ;;  %v87_v2 = vld [vmem:[#allocation5 + $0x58] sm:$0xff]  ;;  %v1797_v4 = vpack.c.bf16 %v135_v61, %v134_v60  ;;  %v104_v6 = vld [vmem:[#allocation5 + $0xe0] sm:$0xff] }
  0x47   :  { %1760 = vmatpush3.bf16.msra.mxu0 %v1759_v48  ;;  %v118_v3 = vld [vmem:[#allocation5 + $0x150] sm:$0xff]  ;;  %v119_v5 = vld [vmem:[#allocation5 + $0x158] sm:$0xff]  ;;  %v105_v7 = vld [vmem:[#allocation5 + $0xe8] sm:$0xff]  ;;  %v1767_v10 = vpack.c.bf16 %v87_v2, %v86_v1 }
  0x48   :  { %1762 = vmatprep.subr.bf16.mxu0 %v1761_v52  ;;  %v136_v8 = vld [vmem:[#allocation5 + $0x1e0] sm:$0xff]  ;;  %v137_v9 = vld [vmem:[#allocation5 + $0x1e8] sm:$0xff]  ;;  %v1799_v13 = vpack.c.bf16 %v119_v5, %v118_v3  ;;  %v1769_v14 = vpack.c.bf16 %v105_v7, %v104_v6  ;;  %v106_v19 = vld [vmem:[#allocation5 + $0xf0] sm:$0xff] }
  0x49   :  { %1792 = vmatpush3.bf16.msra.mxu1 %v1791_v51  ;;  %v88_v11 = vld [vmem:[#allocation5 + $0x60] sm:$0xff]  ;;  %v89_v12 = vld [vmem:[#allocation5 + $0x68] sm:$0xff]  ;;  %v1801_v18 = vpack.c.bf16 %v137_v9, %v136_v8  ;;  %v107_v20 = vld [vmem:[#allocation5 + $0xf8] sm:$0xff] }
  0x4a   :  { %1794 = vmatprep.subr.bf16.mxu1 %v1793_v56  ;;  %v120_v15 = vld [vmem:[#allocation5 + $0x160] sm:$0xff]  ;;  %v121_v16 = vld [vmem:[#allocation5 + $0x168] sm:$0xff]  ;;  %v55_v21 = vld [vmem:[#allocation2 + $0x18] sm:$0xff]  ;;  %v1771_v24 = vpack.c.bf16 %v89_v12, %v88_v11  ;;  %v1773_v26 = vpack.c.bf16 %v107_v20, %v106_v19 }
  0x4b   :  { %1764 = vmatpush3.bf16.msra.mxu0 %v1763_v62  ;;  %v53_v17 = vld [vmem:[#allocation2 + $0x8] sm:$0xff]  ;;  %v138_v22 = vld [vmem:[#allocation5 + $0x1f0] sm:$0xff]  ;;  %v139_v23 = vld [vmem:[#allocation5 + $0x1f8] sm:$0xff]  ;;  %601 = vmatprep.mubr.f32.mxu1 %v55_v21  ;;  %v1803_v25 = vpack.c.bf16 %v121_v16, %v120_v15 }
  0x4c   :  { %1766 = vmatprep.subr.bf16.mxu0 %v1765_v0  ;;  %531 = vmatprep.mubr.f32.mxu0 %v53_v17  ;;  %v90_v27 = vld [vmem:[#allocation5 + $0x70] sm:$0xff]  ;;  %v91_v28 = vld [vmem:[#allocation5 + $0x78] sm:$0xff]  ;;  %v1805_v30 = vpack.c.bf16 %v139_v23, %v138_v22  ;;  %v156_v32 = vld [vmem:[#allocation5 + $0x280] sm:$0xff] }
  0x4d   :  { %1796 = vmatpush3.bf16.msra.mxu1 %v1795_v63  ;;  %v122_v29 = vld [vmem:[#allocation5 + $0x170] sm:$0xff]  ;;  %v123_v31 = vld [vmem:[#allocation5 + $0x178] sm:$0xff]  ;;  %v157_v33 = vld [vmem:[#allocation5 + $0x288] sm:$0xff]  ;;  %v1775_v36 = vpack.c.bf16 %v91_v28, %v90_v27 }
  0x4e   :  { %1798 = vmatprep.subr.bf16.mxu1 %v1797_v4  ;;  %v188_v34 = vld [vmem:[#allocation5 + $0x380] sm:$0xff]  ;;  %v189_v35 = vld [vmem:[#allocation5 + $0x388] sm:$0xff]  ;;  %v1807_v37 = vpack.c.bf16 %v123_v31, %v122_v29  ;;  %v1809_v38 = vpack.c.bf16 %v157_v33, %v156_v32  ;;  %v158_v44 = vld [vmem:[#allocation5 + $0x290] sm:$0xff] }
  0x4f   :  { %1768 = vmatpush3.bf16.msra.mxu0 %v1767_v10  ;;  %v140_v39 = vld [vmem:[#allocation5 + $0x200] sm:$0xff]  ;;  %v141_v40 = vld [vmem:[#allocation5 + $0x208] sm:$0xff]  ;;  %v1841_v42 = vpack.c.bf16 %v189_v35, %v188_v34  ;;  %v159_v45 = vld [vmem:[#allocation5 + $0x298] sm:$0xff] }
  0x50   :  { %1770 = vmatprep.subr.bf16.mxu0 %v1769_v14  ;;  %v172_v41 = vld [vmem:[#allocation5 + $0x300] sm:$0xff]  ;;  %v173_v43 = vld [vmem:[#allocation5 + $0x308] sm:$0xff]  ;;  %v190_v46 = vld [vmem:[#allocation5 + $0x390] sm:$0xff]  ;;  %v1811_v49 = vpack.c.bf16 %v141_v40, %v140_v39  ;;  %v1813_v52 = vpack.c.bf16 %v159_v45, %v158_v44 }
  0x51   :  { %1800 = vmatpush3.bf16.msra.mxu1 %v1799_v13  ;;  %v191_v47 = vld [vmem:[#allocation5 + $0x398] sm:$0xff]  ;;  %v52_v48 = vld [vmem:[#allocation2] sm:$0xff]  ;;  %v54_v50 = vld [vmem:[#allocation2 + $0x10] sm:$0xff]  ;;  %v1843_v51 = vpack.c.bf16 %v173_v43, %v172_v41 }
  0x52   :  { %1802 = vmatprep.subr.bf16.mxu1 %v1801_v18  ;;  %v142_v53 = vld [vmem:[#allocation5 + $0x210] sm:$0xff]  ;;  %v143_v54 = vld [vmem:[#allocation5 + $0x218] sm:$0xff]  ;;  %v1845_v56 = vpack.c.bf16 %v191_v47, %v190_v46  ;;  %v160_v58 = vld [vmem:[#allocation5 + $0x2a0] sm:$0xff] }
  0x53   :  { %1772 = vmatpush3.bf16.msra.mxu0 %v1771_v24  ;;  %v174_v55 = vld [vmem:[#allocation5 + $0x310] sm:$0xff]  ;;  %v175_v57 = vld [vmem:[#allocation5 + $0x318] sm:$0xff]  ;;  %v161_v59 = vld [vmem:[#allocation5 + $0x2a8] sm:$0xff]  ;;  %v1815_v62 = vpack.c.bf16 %v143_v54, %v142_v53 }
  0x54   :  { %1774 = vmatprep.subr.bf16.mxu0 %v1773_v26  ;;  %v192_v60 = vld [vmem:[#allocation5 + $0x3a0] sm:$0xff]  ;;  %v193_v61 = vld [vmem:[#allocation5 + $0x3a8] sm:$0xff]  ;;  %v1847_v63 = vpack.c.bf16 %v175_v57, %v174_v55  ;;  %v1817_v0 = vpack.c.bf16 %v161_v59, %v160_v58  ;;  %v162_v6 = vld [vmem:[#allocation5 + $0x2b0] sm:$0xff] }
  0x55   :  { %1804 = vmatpush3.bf16.msra.mxu1 %v1803_v25  ;;  %v144_v1 = vld [vmem:[#allocation5 + $0x220] sm:$0xff]  ;;  %v145_v2 = vld [vmem:[#allocation5 + $0x228] sm:$0xff]  ;;  %v1849_v4 = vpack.c.bf16 %v193_v61, %v192_v60  ;;  %v163_v7 = vld [vmem:[#allocation5 + $0x2b8] sm:$0xff] }
  0x56   :  { %1806 = vmatprep.subr.bf16.mxu1 %v1805_v30  ;;  %v176_v3 = vld [vmem:[#allocation5 + $0x320] sm:$0xff]  ;;  %v177_v5 = vld [vmem:[#allocation5 + $0x328] sm:$0xff]  ;;  %v194_v8 = vld [vmem:[#allocation5 + $0x3b0] sm:$0xff]  ;;  %v1819_v10 = vpack.c.bf16 %v145_v2, %v144_v1  ;;  %v1821_v12 = vpack.c.bf16 %v163_v7, %v162_v6 }
  0x57   :  { %1776 = vmatpush3.bf16.msra.mxu0 %v1775_v36  ;;  %v195_v9 = vld [vmem:[#allocation5 + $0x3b8] sm:$0xff]  ;;  %v1851_v11 = vpack.c.bf16 %v177_v5, %v176_v3  ;;  %v146_v13 = vld [vmem:[#allocation5 + $0x230] sm:$0xff]  ;;  %v164_v18 = vld [vmem:[#allocation5 + $0x2c0] sm:$0xff] }
  0x58   :  { %1810 = vmatprep.subr.bf16.mxu0 %v1809_v38  ;;  %v147_v14 = vld [vmem:[#allocation5 + $0x238] sm:$0xff]  ;;  %v178_v15 = vld [vmem:[#allocation5 + $0x330] sm:$0xff]  ;;  %v1853_v16 = vpack.c.bf16 %v195_v9, %v194_v8  ;;  %v165_v19 = vld [vmem:[#allocation5 + $0x2c8] sm:$0xff] }
  0x59   :  { %1808 = vmatpush3.bf16.msra.mxu1 %v1807_v37  ;;  %v179_v17 = vld [vmem:[#allocation5 + $0x338] sm:$0xff]  ;;  %v196_v20 = vld [vmem:[#allocation5 + $0x3c0] sm:$0xff]  ;;  %v197_v21 = vld [vmem:[#allocation5 + $0x3c8] sm:$0xff]  ;;  %v1823_v22 = vpack.c.bf16 %v147_v14, %v146_v13  ;;  %v1825_v26 = vpack.c.bf16 %v165_v19, %v164_v18 }
  0x5a   :  { %1842 = vmatprep.subr.bf16.mxu1 %v1841_v42  ;;  %532 = vmatmul.mubr.f32.vlgmr.msra.gmra.mrb[0].mxu0 %v52_v48  ;;  %v148_v23 = vld [vmem:[#allocation5 + $0x240] sm:$0xff]  ;;  %v57_v24 = vld [vmem:[#allocation2 + $0x28] sm:$0xff]  ;;  %v1855_v25 = vpack.c.bf16 %v179_v17, %v178_v15  ;;  %v59_v29 = vld [vmem:[#allocation2 + $0x38] sm:$0xff]  ;;  %v1857_v30 = vpack.c.bf16 %v197_v21, %v196_v20 }
  0x5b   :  { %1812 = vmatpush3.bf16.msra.mxu0 %v1811_v49  ;;  %v149_v27 = vld [vmem:[#allocation5 + $0x248] sm:$0xff]  ;;  %v180_v28 = vld [vmem:[#allocation5 + $0x340] sm:$0xff]  ;;  %v166_v32 = vld [vmem:[#allocation5 + $0x2d0] sm:$0xff]  ;;  %671 = vmatprep.mubr.f32.mxu0 %v57_v24 }
  0x5c   :  { %602 = vmatmul.mubr.f32.vlgmr.msra.gmra.mrb[0].mxu1 %v54_v50  ;;  %1814 = vmatprep.subr.bf16.mxu0 %v1813_v52  ;;  %v181_v31 = vld [vmem:[#allocation5 + $0x348] sm:$0xff]  ;;  %v167_v33 = vld [vmem:[#allocation5 + $0x2d8] sm:$0xff]  ;;  %v198_v34 = vld [vmem:[#allocation5 + $0x3d0] sm:$0xff]  ;;  %v1827_v36 = vpack.c.bf16 %v149_v27, %v148_v23 }
  0x5d   :  { %1844 = vmatpush3.bf16.msra.mxu1 %v1843_v51  ;;  %v199_v35 = vld [vmem:[#allocation5 + $0x3d8] sm:$0xff]  ;;  %741 = vmatprep.mubr.f32.mxu1 %v59_v29  ;;  %v1859_v37 = vpack.c.bf16 %v181_v31, %v180_v28  ;;  %v1829_v38 = vpack.c.bf16 %v167_v33, %v166_v32  ;;  %v150_v39 = vld [vmem:[#allocation5 + $0x250] sm:$0xff]  ;;  %v168_v44 = vld [vmem:[#allocation5 + $0x2e0] sm:$0xff] }
  0x5e   :  { %1846 = vmatprep.subr.bf16.mxu1 %v1845_v56  ;;  %v151_v40 = vld [vmem:[#allocation5 + $0x258] sm:$0xff]  ;;  %v182_v41 = vld [vmem:[#allocation5 + $0x350] sm:$0xff]  ;;  %v1861_v42 = vpack.c.bf16 %v199_v35, %v198_v34  ;;  %v169_v45 = vld [vmem:[#allocation5 + $0x2e8] sm:$0xff] }
  0x5f   :  { %1816 = vmatpush3.bf16.msra.mxu0 %v1815_v62  ;;  %v183_v43 = vld [vmem:[#allocation5 + $0x358] sm:$0xff]  ;;  %v200_v46 = vld [vmem:[#allocation5 + $0x3e0] sm:$0xff]  ;;  %v201_v47 = vld [vmem:[#allocation5 + $0x3e8] sm:$0xff]  ;;  %v1831_v48 = vpack.c.bf16 %v151_v40, %v150_v39  ;;  %v1833_v50 = vpack.c.bf16 %v169_v45, %v168_v44 }
  0x60   :  { %1818 = vmatprep.subr.bf16.mxu0 %v1817_v0  ;;  %v1863_v49 = vpack.c.bf16 %v183_v43, %v182_v41  ;;  %v152_v51 = vld [vmem:[#allocation5 + $0x260] sm:$0xff]  ;;  %v153_v52 = vld [vmem:[#allocation5 + $0x268] sm:$0xff]  ;;  %v1865_v54 = vpack.c.bf16 %v201_v47, %v200_v46  ;;  %v170_v56 = vld [vmem:[#allocation5 + $0x2f0] sm:$0xff] }
  0x61   :  { %1848 = vmatpush3.bf16.msra.mxu1 %v1847_v63  ;;  %v184_v53 = vld [vmem:[#allocation5 + $0x360] sm:$0xff]  ;;  %v185_v55 = vld [vmem:[#allocation5 + $0x368] sm:$0xff]  ;;  %v171_v57 = vld [vmem:[#allocation5 + $0x2f8] sm:$0xff]  ;;  %v1835_v60 = vpack.c.bf16 %v153_v52, %v152_v51 }
  0x62   :  { %1850 = vmatprep.subr.bf16.mxu1 %v1849_v4  ;;  %v202_v58 = vld [vmem:[#allocation5 + $0x3f0] sm:$0xff]  ;;  %v203_v59 = vld [vmem:[#allocation5 + $0x3f8] sm:$0xff]  ;;  %v1867_v61 = vpack.c.bf16 %v185_v55, %v184_v53  ;;  %v1837_v62 = vpack.c.bf16 %v171_v57, %v170_v56  ;;  %v220_v4 = vld [vmem:[#allocation5 + $0x480] sm:$0xff] }
  0x63   :  { %1820 = vmatpush3.bf16.msra.mxu0 %v1819_v10  ;;  %v154_v63 = vld [vmem:[#allocation5 + $0x270] sm:$0xff]  ;;  %v155_v0 = vld [vmem:[#allocation5 + $0x278] sm:$0xff]  ;;  %v1869_v2 = vpack.c.bf16 %v203_v59, %v202_v58  ;;  %v221_v5 = vld [vmem:[#allocation5 + $0x488] sm:$0xff] }
  0x64   :  { %1822 = vmatprep.subr.bf16.mxu0 %v1821_v12  ;;  %v186_v1 = vld [vmem:[#allocation5 + $0x370] sm:$0xff]  ;;  %v187_v3 = vld [vmem:[#allocation5 + $0x378] sm:$0xff]  ;;  %v252_v6 = vld [vmem:[#allocation5 + $0x580] sm:$0xff]  ;;  %v1839_v8 = vpack.c.bf16 %v155_v0, %v154_v63  ;;  %v1873_v10 = vpack.c.bf16 %v221_v5, %v220_v4 }
  0x65   :  { %1852 = vmatpush3.bf16.msra.mxu1 %v1851_v11  ;;  %v253_v7 = vld [vmem:[#allocation5 + $0x588] sm:$0xff]  ;;  %v1871_v9 = vpack.c.bf16 %v187_v3, %v186_v1  ;;  %v204_v11 = vld [vmem:[#allocation5 + $0x400] sm:$0xff]  ;;  %v223_v17 = vld [vmem:[#allocation5 + $0x498] sm:$0xff] }
  0x66   :  { %1854 = vmatprep.subr.bf16.mxu1 %v1853_v16  ;;  %v205_v12 = vld [vmem:[#allocation5 + $0x408] sm:$0xff]  ;;  %v236_v13 = vld [vmem:[#allocation5 + $0x500] sm:$0xff]  ;;  %v1905_v14 = vpack.c.bf16 %v253_v7, %v252_v6  ;;  %v222_v16 = vld [vmem:[#allocation5 + $0x490] sm:$0xff] }
  0x67   :  { %1824 = vmatpush3.bf16.msra.mxu0 %v1823_v22  ;;  %v237_v15 = vld [vmem:[#allocation5 + $0x508] sm:$0xff]  ;;  %v254_v18 = vld [vmem:[#allocation5 + $0x590] sm:$0xff]  ;;  %v255_v19 = vld [vmem:[#allocation5 + $0x598] sm:$0xff]  ;;  %v1875_v21 = vpack.c.bf16 %v205_v12, %v204_v11  ;;  %v1877_v24 = vpack.c.bf16 %v223_v17, %v222_v16 }
  0x68   :  { %1826 = vmatprep.subr.bf16.mxu0 %v1825_v26  ;;  %v56_v20 = vld [vmem:[#allocation2 + $0x20] sm:$0xff]  ;;  %v58_v22 = vld [vmem:[#allocation2 + $0x30] sm:$0xff]  ;;  %v1907_v23 = vpack.c.bf16 %v237_v15, %v236_v13  ;;  %v207_v26 = vld [vmem:[#allocation5 + $0x418] sm:$0xff]  ;;  %v1909_v28 = vpack.c.bf16 %v255_v19, %v254_v18 }
  0x69   :  { %1856 = vmatpush3.bf16.msra.mxu1 %v1855_v25  ;;  %v206_v25 = vld [vmem:[#allocation5 + $0x410] sm:$0xff]  ;;  %v239_v29 = vld [vmem:[#allocation5 + $0x518] sm:$0xff]  ;;  %v225_v31 = vld [vmem:[#allocation5 + $0x4a8] sm:$0xff] }
  0x6a   :  { %1858 = vmatprep.subr.bf16.mxu1 %v1857_v30  ;;  %v238_v27 = vld [vmem:[#allocation5 + $0x510] sm:$0xff]  ;;  %v224_v30 = vld [vmem:[#allocation5 + $0x4a0] sm:$0xff]  ;;  %v257_v33 = vld [vmem:[#allocation5 + $0x5a8] sm:$0xff]  ;;  %v1879_v35 = vpack.c.bf16 %v207_v26, %v206_v25 }
  0x6b   :  { %1828 = vmatpush3.bf16.msra.mxu0 %v1827_v36  ;;  %v256_v32 = vld [vmem:[#allocation5 + $0x5a0] sm:$0xff]  ;;  %v61_v34 = vld [vmem:[#allocation2 + $0x48] sm:$0xff]  ;;  %v63_v36 = vld [vmem:[#allocation2 + $0x58] sm:$0xff] }
  0x6c   :  { %1830 = vmatprep.subr.bf16.mxu0 %v1829_v38  ;;  %v1881_v38 = vpack.c.bf16 %v225_v31, %v224_v30  ;;  %v208_v39 = vld [vmem:[#allocation5 + $0x420] sm:$0xff]  ;;  %v209_v40 = vld [vmem:[#allocation5 + $0x428] sm:$0xff]  ;;  %v226_v44 = vld [vmem:[#allocation5 + $0x4b0] sm:$0xff] }
  0x6d   :  { %1860 = vmatpush3.bf16.msra.mxu1 %v1859_v37  ;;  %v1911_v37 = vpack.c.bf16 %v239_v29, %v238_v27  ;;  %v240_v41 = vld [vmem:[#allocation5 + $0x520] sm:$0xff]  ;;  %v241_v43 = vld [vmem:[#allocation5 + $0x528] sm:$0xff]  ;;  %v227_v45 = vld [vmem:[#allocation5 + $0x4b8] sm:$0xff] }
  0x6e   :  { %1862 = vmatprep.subr.bf16.mxu1 %v1861_v42  ;;  %v1913_v42 = vpack.c.bf16 %v257_v33, %v256_v32  ;;  %v258_v46 = vld [vmem:[#allocation5 + $0x5b0] sm:$0xff]  ;;  %v259_v47 = vld [vmem:[#allocation5 + $0x5b8] sm:$0xff]  ;;  %v228_v56 = vld [vmem:[#allocation5 + $0x4c0] sm:$0xff] }
  0x6f   :  { %1832 = vmatpush3.bf16.msra.mxu0 %v1831_v48  ;;  %v1883_v48 = vpack.c.bf16 %v209_v40, %v208_v39  ;;  %v210_v51 = vld [vmem:[#allocation5 + $0x430] sm:$0xff]  ;;  %v211_v52 = vld [vmem:[#allocation5 + $0x438] sm:$0xff]  ;;  %v229_v57 = vld [vmem:[#allocation5 + $0x4c8] sm:$0xff] }
  0x70   :  { %1834 = vmatprep.subr.bf16.mxu0 %v1833_v50  ;;  %v1885_v50 = vpack.c.bf16 %v227_v45, %v226_v44  ;;  %v242_v53 = vld [vmem:[#allocation5 + $0x530] sm:$0xff]  ;;  %v243_v55 = vld [vmem:[#allocation5 + $0x538] sm:$0xff]  ;;  %v260_v58 = vld [vmem:[#allocation5 + $0x5c0] sm:$0xff] }
  0x71   :  { %1864 = vmatpush3.bf16.msra.mxu1 %v1863_v49  ;;  %v1915_v49 = vpack.c.bf16 %v241_v43, %v240_v41  ;;  %v261_v59 = vld [vmem:[#allocation5 + $0x5c8] sm:$0xff]  ;;  %v212_v63 = vld [vmem:[#allocation5 + $0x440] sm:$0xff]  ;;  %v230_v4 = vld [vmem:[#allocation5 + $0x4d0] sm:$0xff] }
  0x72   :  { %1866 = vmatprep.subr.bf16.mxu1 %v1865_v54  ;;  %v1917_v54 = vpack.c.bf16 %v259_v47, %v258_v46  ;;  %v213_v0 = vld [vmem:[#allocation5 + $0x448] sm:$0xff]  ;;  %v244_v1 = vld [vmem:[#allocation5 + $0x540] sm:$0xff]  ;;  %v231_v5 = vld [vmem:[#allocation5 + $0x4d8] sm:$0xff] }
  0x73   :  { %1836 = vmatpush3.bf16.msra.mxu0 %v1835_v60  ;;  %v1887_v60 = vpack.c.bf16 %v211_v52, %v210_v51  ;;  %v245_v3 = vld [vmem:[#allocation5 + $0x548] sm:$0xff]  ;;  %v262_v6 = vld [vmem:[#allocation5 + $0x5d0] sm:$0xff]  ;;  %v263_v7 = vld [vmem:[#allocation5 + $0x5d8] sm:$0xff] }
  0x74   :  { %1838 = vmatprep.subr.bf16.mxu0 %v1837_v62  ;;  %v1889_v62 = vpack.c.bf16 %v229_v57, %v228_v56  ;;  %v214_v11 = vld [vmem:[#allocation5 + $0x450] sm:$0xff]  ;;  %v215_v12 = vld [vmem:[#allocation5 + $0x458] sm:$0xff]  ;;  %v232_v16 = vld [vmem:[#allocation5 + $0x4e0] sm:$0xff] }
  0x75   :  { %1868 = vmatpush3.bf16.msra.mxu1 %v1867_v61  ;;  %v1919_v61 = vpack.c.bf16 %v243_v55, %v242_v53  ;;  %v246_v13 = vld [vmem:[#allocation5 + $0x550] sm:$0xff]  ;;  %v247_v15 = vld [vmem:[#allocation5 + $0x558] sm:$0xff]  ;;  %v233_v17 = vld [vmem:[#allocation5 + $0x4e8] sm:$0xff] }
  0x76   :  { %1870 = vmatprep.subr.bf16.mxu1 %v1869_v2  ;;  %v1921_v2 = vpack.c.bf16 %v261_v59, %v260_v58  ;;  %v264_v18 = vld [vmem:[#allocation5 + $0x5e0] sm:$0xff]  ;;  %v265_v19 = vld [vmem:[#allocation5 + $0x5e8] sm:$0xff]  ;;  %v235_v29 = vld [vmem:[#allocation5 + $0x4f8] sm:$0xff] }
  0x77   :  { %1840 = vmatpush3.bf16.msra.mxu0 %v1839_v8  ;;  %v1891_v8 = vpack.c.bf16 %v213_v0, %v212_v63  ;;  %v248_v25 = vld [vmem:[#allocation5 + $0x560] sm:$0xff]  ;;  %v1929_v26 = vpack.c.bf16 %v265_v19, %v264_v18  ;;  %v249_v27 = vld [vmem:[#allocation5 + $0x568] sm:$0xff]  ;;  %v266_v30 = vld [vmem:[#allocation5 + $0x5f0] sm:$0xff] }
  0x78   :  { %1874 = vmatprep.subr.bf16.mxu0 %v1873_v10  ;;  %v1893_v10 = vpack.c.bf16 %v231_v5, %v230_v4  ;;  %v267_v31 = vld [vmem:[#allocation5 + $0x5f8] sm:$0xff]  ;;  %v1931_v33 = vpack.c.bf16 %v249_v27, %v248_v25  ;;  %v284_v40 = vld [vmem:[#allocation5 + $0x680] sm:$0xff]  ;;  %v285_v41 = vld [vmem:[#allocation5 + $0x688] sm:$0xff] }
  0x79   :  { %1872 = vmatpush3.bf16.msra.mxu1 %v1871_v9  ;;  %v1923_v9 = vpack.c.bf16 %v245_v3, %v244_v1  ;;  %v251_v39 = vld [vmem:[#allocation5 + $0x578] sm:$0xff]  ;;  %v317_v43 = vld [vmem:[#allocation5 + $0x788] sm:$0xff]  ;;  %v1937_v46 = vpack.c.bf16 %v285_v41, %v284_v40  ;;  %v268_v47 = vld [vmem:[#allocation5 + $0x600] sm:$0xff] }
  0x7a   :  { %1906 = vmatprep.subr.bf16.mxu1 %v1905_v14  ;;  %672 = vmatmul.mubr.f32.vlgmr.msra.gmra.mrb[2].mxu0 %v56_v20  ;;  %v1925_v14 = vpack.c.bf16 %v263_v7, %v262_v6  ;;  %v1895_v20 = vpack.c.bf16 %v215_v12, %v214_v11  ;;  %v301_v51 = vld [vmem:[#allocation5 + $0x708] sm:$0xff]  ;;  %v286_v52 = vld [vmem:[#allocation5 + $0x690] sm:$0xff]  ;;  %v287_v53 = vld [vmem:[#allocation5 + $0x698] sm:$0xff] }
  0x7b   :  { %1876 = vmatpush3.bf16.msra.mxu0 %v1875_v21  ;;  %811 = vmatprep.mubr.f32.mxu0 %v61_v34  ;;  %v1927_v21 = vpack.c.bf16 %v247_v15, %v246_v13  ;;  %v319_v55 = vld [vmem:[#allocation5 + $0x798] sm:$0xff]  ;;  %v60_v56 = vld [vmem:[#allocation2 + $0x40] sm:$0xff]  ;;  %v62_v58 = vld [vmem:[#allocation2 + $0x50] sm:$0xff] }
  0x7c   :  { %742 = vmatmul.mubr.f32.vlgmr.msra.gmra.mrb[2].mxu1 %v58_v22  ;;  %1878 = vmatprep.subr.bf16.mxu0 %v1877_v24  ;;  %v1897_v22 = vpack.c.bf16 %v233_v17, %v232_v16  ;;  %v217_v24 = vld [vmem:[#allocation5 + $0x468] sm:$0xff]  ;;  %v302_v63 = vld [vmem:[#allocation5 + $0x710] sm:$0xff]  ;;  %v303_v1 = vld [vmem:[#allocation5 + $0x718] sm:$0xff] }
  0x7d   :  { %1908 = vmatpush3.bf16.msra.mxu1 %v1907_v23  ;;  %881 = vmatprep.mubr.f32.mxu1 %v63_v36  ;;  %v216_v23 = vld [vmem:[#allocation5 + $0x460] sm:$0xff]  ;;  %v219_v36 = vld [vmem:[#allocation5 + $0x478] sm:$0xff]  ;;  %v289_v3 = vld [vmem:[#allocation5 + $0x6a8] sm:$0xff] }
  0x7e   :  { %1910 = vmatprep.subr.bf16.mxu1 %v1909_v28  ;;  %v234_v28 = vld [vmem:[#allocation5 + $0x4f0] sm:$0xff]  ;;  %v1899_v32 = vpack.c.bf16 %v217_v24, %v216_v23  ;;  %v320_v4 = vld [vmem:[#allocation5 + $0x7a0] sm:$0xff]  ;;  %v321_v5 = vld [vmem:[#allocation5 + $0x7a8] sm:$0xff] }
  0x7f   :  { %1880 = vmatpush3.bf16.msra.mxu0 %v1879_v35  ;;  %v1901_v34 = vpack.c.bf16 %v235_v29, %v234_v28  ;;  %v218_v35 = vld [vmem:[#allocation5 + $0x470] sm:$0xff]  ;;  %v65_v6 = vld [vmem:[#allocation2 + $0x68] sm:$0xff]  ;;  %v272_v11 = vld [vmem:[#allocation5 + $0x620] sm:$0xff] }
  0x80   :  { %1882 = vmatprep.subr.bf16.mxu0 %v1881_v38  ;;  %v1933_v38 = vpack.c.bf16 %v267_v31, %v266_v30  ;;  %v1903_v44 = vpack.c.bf16 %v219_v36, %v218_v35  ;;  %v273_v12 = vld [vmem:[#allocation5 + $0x628] sm:$0xff]  ;;  %v304_v13 = vld [vmem:[#allocation5 + $0x720] sm:$0xff]  ;;  %v290_v16 = vld [vmem:[#allocation5 + $0x6b0] sm:$0xff] }
  0x81   :  { %1912 = vmatpush3.bf16.msra.mxu1 %v1911_v37  ;;  %v250_v37 = vld [vmem:[#allocation5 + $0x570] sm:$0xff]  ;;  %v305_v15 = vld [vmem:[#allocation5 + $0x728] sm:$0xff]  ;;  %v291_v17 = vld [vmem:[#allocation5 + $0x6b8] sm:$0xff] }
  0x82   :  { %1914 = vmatprep.subr.bf16.mxu1 %v1913_v42  ;;  %v316_v42 = vld [vmem:[#allocation5 + $0x780] sm:$0xff]  ;;  %v1935_v45 = vpack.c.bf16 %v251_v39, %v250_v37  ;;  %v322_v18 = vld [vmem:[#allocation5 + $0x7b0] sm:$0xff]  ;;  %v323_v19 = vld [vmem:[#allocation5 + $0x7b8] sm:$0xff] }
  0x83   :  { %1884 = vmatpush3.bf16.msra.mxu0 %v1883_v48  ;;  %v269_v48 = vld [vmem:[#allocation5 + $0x608] sm:$0xff]  ;;  %v274_v23 = vld [vmem:[#allocation5 + $0x630] sm:$0xff]  ;;  %v275_v24 = vld [vmem:[#allocation5 + $0x638] sm:$0xff] }
  0x84   :  { %1886 = vmatprep.subr.bf16.mxu0 %v1885_v50  ;;  %v1969_v50 = vpack.c.bf16 %v317_v43, %v316_v42  ;;  %v1939_v57 = vpack.c.bf16 %v269_v48, %v268_v47  ;;  %v306_v25 = vld [vmem:[#allocation5 + $0x730] sm:$0xff]  ;;  %v307_v27 = vld [vmem:[#allocation5 + $0x738] sm:$0xff]  ;;  %v292_v28 = vld [vmem:[#allocation5 + $0x6c0] sm:$0xff] }
  0x85   :  { %1916 = vmatpush3.bf16.msra.mxu1 %v1915_v49  ;;  %v300_v49 = vld [vmem:[#allocation5 + $0x700] sm:$0xff]  ;;  %v293_v29 = vld [vmem:[#allocation5 + $0x6c8] sm:$0xff]  ;;  %v294_v40 = vld [vmem:[#allocation5 + $0x6d0] sm:$0xff] }
  0x86   :  { %1918 = vmatprep.subr.bf16.mxu1 %v1917_v54  ;;  %v318_v54 = vld [vmem:[#allocation5 + $0x790] sm:$0xff]  ;;  %v1971_v59 = vpack.c.bf16 %v301_v51, %v300_v49  ;;  %v324_v30 = vld [vmem:[#allocation5 + $0x7c0] sm:$0xff]  ;;  %v325_v31 = vld [vmem:[#allocation5 + $0x7c8] sm:$0xff] }
  0x87   :  { %1888 = vmatpush3.bf16.msra.mxu0 %v1887_v60  ;;  %v1941_v60 = vpack.c.bf16 %v287_v53, %v286_v52  ;;  %v1973_v0 = vpack.c.bf16 %v319_v55, %v318_v54  ;;  %v276_v35 = vld [vmem:[#allocation5 + $0x640] sm:$0xff]  ;;  %v277_v36 = vld [vmem:[#allocation5 + $0x648] sm:$0xff]  ;;  %v295_v41 = vld [vmem:[#allocation5 + $0x6d8] sm:$0xff] }
  0x88   :  { %1890 = vmatprep.subr.bf16.mxu0 %v1889_v62  ;;  %v271_v62 = vld [vmem:[#allocation5 + $0x618] sm:$0xff]  ;;  %v308_v37 = vld [vmem:[#allocation5 + $0x740] sm:$0xff]  ;;  %v309_v39 = vld [vmem:[#allocation5 + $0x748] sm:$0xff] }
  0x89   :  { %1920 = vmatpush3.bf16.msra.mxu1 %v1919_v61  ;;  %v270_v61 = vld [vmem:[#allocation5 + $0x610] sm:$0xff]  ;;  %v327_v43 = vld [vmem:[#allocation5 + $0x7d8] sm:$0xff]  ;;  %v296_v52 = vld [vmem:[#allocation5 + $0x6e0] sm:$0xff] }
  0x8a   :  { %1922 = vmatprep.subr.bf16.mxu1 %v1921_v2  ;;  %v288_v2 = vld [vmem:[#allocation5 + $0x6a0] sm:$0xff]  ;;  %v1943_v7 = vpack.c.bf16 %v271_v62, %v270_v61  ;;  %v326_v42 = vld [vmem:[#allocation5 + $0x7d0] sm:$0xff]  ;;  %v279_v48 = vld [vmem:[#allocation5 + $0x658] sm:$0xff] }
  0x8b   :  { %1892 = vmatpush3.bf16.msra.mxu0 %v1891_v8  ;;  %v67_v8 = vld [vmem:[#allocation2 + $0x78] sm:$0xff]  ;;  %v278_v47 = vld [vmem:[#allocation5 + $0x650] sm:$0xff]  ;;  %v297_v53 = vld [vmem:[#allocation5 + $0x6e8] sm:$0xff] }
  0x8c   :  { %1894 = vmatprep.subr.bf16.mxu0 %v1893_v10  ;;  %v1945_v10 = vpack.c.bf16 %v289_v3, %v288_v2  ;;  %v310_v49 = vld [vmem:[#allocation5 + $0x750] sm:$0xff]  ;;  %v311_v51 = vld [vmem:[#allocation5 + $0x758] sm:$0xff]  ;;  %v328_v54 = vld [vmem:[#allocation5 + $0x7e0] sm:$0xff] }
  0x8d   :  { %1924 = vmatpush3.bf16.msra.mxu1 %v1923_v9  ;;  %v1975_v9 = vpack.c.bf16 %v303_v1, %v302_v63  ;;  %v329_v55 = vld [vmem:[#allocation5 + $0x7e8] sm:$0xff]  ;;  %v312_v61 = vld [vmem:[#allocation5 + $0x760] sm:$0xff]  ;;  %v299_v1 = vld [vmem:[#allocation5 + $0x6f8] sm:$0xff] }
  0x8e   :  { %1926 = vmatprep.subr.bf16.mxu1 %v1925_v14  ;;  %v1977_v14 = vpack.c.bf16 %v321_v5, %v320_v4  ;;  %v1993_v62 = vpack.c.bf16 %v329_v55, %v328_v54  ;;  %v313_v63 = vld [vmem:[#allocation5 + $0x768] sm:$0xff]  ;;  %v330_v2 = vld [vmem:[#allocation5 + $0x7f0] sm:$0xff]  ;;  %v331_v3 = vld [vmem:[#allocation5 + $0x7f8] sm:$0xff] }
  0x8f   :  { %1896 = vmatpush3.bf16.msra.mxu0 %v1895_v20  ;;  %v1947_v20 = vpack.c.bf16 %v273_v12, %v272_v11  ;;  %v1995_v5 = vpack.c.bf16 %v313_v63, %v312_v61  ;;  %v315_v11 = vld [vmem:[#allocation5 + $0x778] sm:$0xff]  ;;  %v348_v12 = vld [vmem:[#allocation5 + $0x880] sm:$0xff]  ;;  %v386_v54 = vld [vmem:[#allocation5 + $0x9b0] sm:$0xff] }
  0x90   :  { %1898 = vmatprep.subr.bf16.mxu0 %v1897_v22  ;;  %v1949_v22 = vpack.c.bf16 %v291_v17, %v290_v16  ;;  %v387_v55 = vld [vmem:[#allocation5 + $0x9b8] sm:$0xff]  ;;  %v370_v61 = vld [vmem:[#allocation5 + $0x930] sm:$0xff] }
  0x91   :  { %1928 = vmatpush3.bf16.msra.mxu1 %v1927_v21  ;;  %v1979_v21 = vpack.c.bf16 %v305_v15, %v304_v13  ;;  %v349_v13 = vld [vmem:[#allocation5 + $0x888] sm:$0xff]  ;;  %v371_v63 = vld [vmem:[#allocation5 + $0x938] sm:$0xff] }
  0x92   :  { %1930 = vmatprep.subr.bf16.mxu1 %v1929_v26  ;;  %v1981_v26 = vpack.c.bf16 %v323_v19, %v322_v18  ;;  %v381_v15 = vld [vmem:[#allocation5 + $0x988] sm:$0xff]  ;;  %v2001_v18 = vpack.c.bf16 %v349_v13, %v348_v12  ;;  %v332_v19 = vld [vmem:[#allocation5 + $0x800] sm:$0xff]  ;;  %v358_v12 = vld [vmem:[#allocation5 + $0x8d0] sm:$0xff] }
  0x93   :  { %1900 = vmatpush3.bf16.msra.mxu0 %v1899_v32  ;;  %v1951_v32 = vpack.c.bf16 %v275_v24, %v274_v23  ;;  %v365_v23 = vld [vmem:[#allocation5 + $0x908] sm:$0xff]  ;;  %v350_v24 = vld [vmem:[#allocation5 + $0x890] sm:$0xff]  ;;  %v359_v13 = vld [vmem:[#allocation5 + $0x8d8] sm:$0xff] }
  0x94   :  { %1902 = vmatprep.subr.bf16.mxu0 %v1901_v34  ;;  %v1953_v34 = vpack.c.bf16 %v293_v29, %v292_v28  ;;  %v64_v28 = vld [vmem:[#allocation2 + $0x60] sm:$0xff] }
  0x95   :  { %1932 = vmatpush3.bf16.msra.mxu1 %v1931_v33  ;;  %v1983_v33 = vpack.c.bf16 %v307_v27, %v306_v25  ;;  %v351_v25 = vld [vmem:[#allocation5 + $0x898] sm:$0xff] }
  0x96   :  { %1934 = vmatprep.subr.bf16.mxu1 %v1933_v38  ;;  %v1985_v38 = vpack.c.bf16 %v325_v31, %v324_v30  ;;  %v383_v27 = vld [vmem:[#allocation5 + $0x998] sm:$0xff]  ;;  %v66_v30 = vld [vmem:[#allocation2 + $0x70] sm:$0xff] }
  0x97   :  { %1904 = vmatpush3.bf16.msra.mxu0 %v1903_v44  ;;  %v1955_v44 = vpack.c.bf16 %v277_v36, %v276_v35  ;;  %v366_v35 = vld [vmem:[#allocation5 + $0x910] sm:$0xff] }
  0x98   :  { %1938 = vmatprep.subr.bf16.mxu0 %v1937_v46  ;;  %v1957_v46 = vpack.c.bf16 %v295_v41, %v294_v40  ;;  %v384_v40 = vld [vmem:[#allocation5 + $0x9a0] sm:$0xff]  ;;  %v385_v41 = vld [vmem:[#allocation5 + $0x9a8] sm:$0xff] }
  0x99   :  { %1936 = vmatpush3.bf16.msra.mxu1 %v1935_v45  ;;  %v1987_v45 = vpack.c.bf16 %v309_v39, %v308_v37  ;;  %v367_v37 = vld [vmem:[#allocation5 + $0x918] sm:$0xff]  ;;  %v353_v39 = vld [vmem:[#allocation5 + $0x8a8] sm:$0xff] }
  0x9a   :  { %1970 = vmatprep.subr.bf16.mxu1 %v1969_v50  ;;  %812 = vmatmul.mubr.f32.vlgmr.msra.gmra.mrb[4].mxu0 %v60_v56  ;;  %v1989_v50 = vpack.c.bf16 %v327_v43, %v326_v42  ;;  %v1959_v56 = vpack.c.bf16 %v279_v48, %v278_v47  ;;  %v69_v42 = vld [vmem:[#allocation2 + $0x88] sm:$0xff]  ;;  %v336_v47 = vld [vmem:[#allocation5 + $0x820] sm:$0xff] }
  0x9b   :  { %1940 = vmatpush3.bf16.msra.mxu0 %v1939_v57  ;;  %951 = vmatprep.mubr.f32.mxu0 %v65_v6  ;;  %v1991_v57 = vpack.c.bf16 %v311_v51, %v310_v49  ;;  %v337_v48 = vld [vmem:[#allocation5 + $0x828] sm:$0xff]  ;;  %v368_v49 = vld [vmem:[#allocation5 + $0x920] sm:$0xff] }
  0x9c   :  { %882 = vmatmul.mubr.f32.vlgmr.msra.gmra.mrb[4].mxu1 %v62_v58  ;;  %1942 = vmatprep.subr.bf16.mxu0 %v1941_v60  ;;  %v1961_v58 = vpack.c.bf16 %v297_v53, %v296_v52  ;;  %v281_v60 = vld [vmem:[#allocation5 + $0x668] sm:$0xff]  ;;  %v354_v52 = vld [vmem:[#allocation5 + $0x8b0] sm:$0xff]  ;;  %v355_v53 = vld [vmem:[#allocation5 + $0x8b8] sm:$0xff] }
  0x9d   :  { %1972 = vmatpush3.bf16.msra.mxu1 %v1971_v59  ;;  %1021 = vmatprep.mubr.f32.mxu1 %v67_v8  ;;  %v280_v59 = vld [vmem:[#allocation5 + $0x660] sm:$0xff]  ;;  %v283_v8 = vld [vmem:[#allocation5 + $0x678] sm:$0xff]  ;;  %v369_v51 = vld [vmem:[#allocation5 + $0x928] sm:$0xff] }
  0x9e   :  { %1974 = vmatprep.subr.bf16.mxu1 %v1973_v0  ;;  %v298_v0 = vld [vmem:[#allocation5 + $0x6f0] sm:$0xff]  ;;  %v1963_v4 = vpack.c.bf16 %v281_v60, %v280_v59  ;;  %v339_v60 = vld [vmem:[#allocation5 + $0x838] sm:$0xff] }
  0x9f   :  { %1944 = vmatpush3.bf16.msra.mxu0 %v1943_v7  ;;  %v1965_v6 = vpack.c.bf16 %v299_v1, %v298_v0  ;;  %v282_v7 = vld [vmem:[#allocation5 + $0x670] sm:$0xff]  ;;  %v356_v0 = vld [vmem:[#allocation5 + $0x8c0] sm:$0xff]  ;;  %v357_v1 = vld [vmem:[#allocation5 + $0x8c8] sm:$0xff] }
  0xa0   :  { %1946 = vmatprep.subr.bf16.mxu0 %v1945_v10  ;;  %v1997_v10 = vpack.c.bf16 %v331_v3, %v330_v2  ;;  %v1967_v16 = vpack.c.bf16 %v283_v8, %v282_v7  ;;  %v338_v59 = vld [vmem:[#allocation5 + $0x830] sm:$0xff]  ;;  %v388_v2 = vld [vmem:[#allocation5 + $0x9c0] sm:$0xff]  ;;  %v389_v3 = vld [vmem:[#allocation5 + $0x9c8] sm:$0xff] }
  0xa1   :  { %1976 = vmatpush3.bf16.msra.mxu1 %v1975_v9  ;;  %v314_v9 = vld [vmem:[#allocation5 + $0x770] sm:$0xff]  ;;  %v340_v7 = vld [vmem:[#allocation5 + $0x840] sm:$0xff]  ;;  %v341_v8 = vld [vmem:[#allocation5 + $0x848] sm:$0xff] }
  0xa2   :  { %1978 = vmatprep.subr.bf16.mxu1 %v1977_v14  ;;  %v380_v14 = vld [vmem:[#allocation5 + $0x980] sm:$0xff]  ;;  %v1999_v17 = vpack.c.bf16 %v315_v11, %v314_v9  ;;  %v373_v11 = vld [vmem:[#allocation5 + $0x948] sm:$0xff] }
  0xa3   :  { %1948 = vmatpush3.bf16.msra.mxu0 %v1947_v20  ;;  %v333_v20 = vld [vmem:[#allocation5 + $0x808] sm:$0xff]  ;;  %v372_v9 = vld [vmem:[#allocation5 + $0x940] sm:$0xff] }
  0xa4   :  { %1950 = vmatprep.subr.bf16.mxu0 %v1949_v22  ;;  %v2033_v22 = vpack.c.bf16 %v381_v15, %v380_v14  ;;  %v2003_v29 = vpack.c.bf16 %v333_v20, %v332_v19  ;;  %v390_v14 = vld [vmem:[#allocation5 + $0x9d0] sm:$0xff]  ;;  %v391_v15 = vld [vmem:[#allocation5 + $0x9d8] sm:$0xff] }
  0xa5   :  { %1980 = vmatpush3.bf16.msra.mxu1 %v1979_v21  ;;  %v364_v21 = vld [vmem:[#allocation5 + $0x900] sm:$0xff]  ;;  %v342_v19 = vld [vmem:[#allocation5 + $0x850] sm:$0xff]  ;;  %v343_v20 = vld [vmem:[#allocation5 + $0x858] sm:$0xff] }
  0xa6   :  { %1982 = vmatprep.subr.bf16.mxu1 %v1981_v26  ;;  %v382_v26 = vld [vmem:[#allocation5 + $0x990] sm:$0xff]  ;;  %v2035_v31 = vpack.c.bf16 %v365_v23, %v364_v21  ;;  %v375_v23 = vld [vmem:[#allocation5 + $0x958] sm:$0xff] }
  0xa7   :  { %1952 = vmatpush3.bf16.msra.mxu0 %v1951_v32  ;;  %v2005_v32 = vpack.c.bf16 %v351_v25, %v350_v24  ;;  %v2037_v36 = vpack.c.bf16 %v383_v27, %v382_v26  ;;  %v374_v21 = vld [vmem:[#allocation5 + $0x950] sm:$0xff]  ;;  %v360_v24 = vld [vmem:[#allocation5 + $0x8e0] sm:$0xff]  ;;  %v361_v25 = vld [vmem:[#allocation5 + $0x8e8] sm:$0xff] }
  0xa8   :  { %1954 = vmatprep.subr.bf16.mxu0 %v1953_v34  ;;  %v335_v34 = vld [vmem:[#allocation5 + $0x818] sm:$0xff]  ;;  %v392_v26 = vld [vmem:[#allocation5 + $0x9e0] sm:$0xff]  ;;  %v393_v27 = vld [vmem:[#allocation5 + $0x9e8] sm:$0xff] }
  0xa9   :  { %1984 = vmatpush3.bf16.msra.mxu1 %v1983_v33  ;;  %v334_v33 = vld [vmem:[#allocation5 + $0x810] sm:$0xff] }
  0xaa   :  { %1986 = vmatprep.subr.bf16.mxu1 %v1985_v38  ;;  %v352_v38 = vld [vmem:[#allocation5 + $0x8a0] sm:$0xff]  ;;  %v2007_v43 = vpack.c.bf16 %v335_v34, %v334_v33  ;;  %v2057_v34 = vpack.c.bf16 %v393_v27, %v392_v26  ;;  %v450_v26 = vld [vmem:[#allocation5 + $0xbb0] sm:$0xff]  ;;  %v451_v27 = vld [vmem:[#allocation5 + $0xbb8] sm:$0xff] }
  0xab   :  { %1956 = vmatpush3.bf16.msra.mxu0 %v1955_v44  ;;  %v71_v44 = vld [vmem:[#allocation2 + $0x98] sm:$0xff]  ;;  %v376_v33 = vld [vmem:[#allocation5 + $0x960] sm:$0xff] }
  0xac   :  { %1958 = vmatprep.subr.bf16.mxu0 %v1957_v46  ;;  %v2009_v46 = vpack.c.bf16 %v353_v39, %v352_v38  ;;  %v394_v38 = vld [vmem:[#allocation5 + $0x9f0] sm:$0xff]  ;;  %v395_v39 = vld [vmem:[#allocation5 + $0x9f8] sm:$0xff] }
  0xad   :  { %1988 = vmatpush3.bf16.msra.mxu1 %v1987_v45  ;;  %v2039_v45 = vpack.c.bf16 %v367_v37, %v366_v35  ;;  %v377_v35 = vld [vmem:[#allocation5 + $0x968] sm:$0xff]  ;;  %v363_v37 = vld [vmem:[#allocation5 + $0x8f8] sm:$0xff] }
  0xae   :  { %1990 = vmatprep.subr.bf16.mxu1 %v1989_v50  ;;  %v2041_v50 = vpack.c.bf16 %v385_v41, %v384_v40  ;;  %v2059_v41 = vpack.c.bf16 %v377_v35, %v376_v33  ;;  %v434_v33 = vld [vmem:[#allocation5 + $0xb30] sm:$0xff]  ;;  %v435_v35 = vld [vmem:[#allocation5 + $0xb38] sm:$0xff] }
  0xaf   :  { %1960 = vmatpush3.bf16.msra.mxu0 %v1959_v56  ;;  %v2011_v56 = vpack.c.bf16 %v337_v48, %v336_v47  ;;  %v379_v47 = vld [vmem:[#allocation5 + $0x978] sm:$0xff]  ;;  %v412_v48 = vld [vmem:[#allocation5 + $0xa80] sm:$0xff] }
  0xb0   :  { %1962 = vmatprep.subr.bf16.mxu0 %v1961_v58  ;;  %v2013_v58 = vpack.c.bf16 %v355_v53, %v354_v52 }
  0xb1   :  { %1992 = vmatpush3.bf16.msra.mxu1 %v1991_v57  ;;  %v2043_v57 = vpack.c.bf16 %v369_v51, %v368_v49  ;;  %v413_v49 = vld [vmem:[#allocation5 + $0xa88] sm:$0xff] }
  0xb2   :  { %1994 = vmatprep.subr.bf16.mxu1 %v1993_v62  ;;  %v2045_v62 = vpack.c.bf16 %v387_v55, %v386_v54  ;;  %v445_v51 = vld [vmem:[#allocation5 + $0xb88] sm:$0xff]  ;;  %v2065_v54 = vpack.c.bf16 %v413_v49, %v412_v48  ;;  %v396_v55 = vld [vmem:[#allocation5 + $0xa00] sm:$0xff]  ;;  %v422_v48 = vld [vmem:[#allocation5 + $0xad0] sm:$0xff] }
  0xb3   :  { %1964 = vmatpush3.bf16.msra.mxu0 %v1963_v4  ;;  %v2015_v4 = vpack.c.bf16 %v339_v60, %v338_v59  ;;  %v429_v59 = vld [vmem:[#allocation5 + $0xb08] sm:$0xff]  ;;  %v414_v60 = vld [vmem:[#allocation5 + $0xa90] sm:$0xff]  ;;  %v423_v49 = vld [vmem:[#allocation5 + $0xad8] sm:$0xff] }
  0xb4   :  { %1966 = vmatprep.subr.bf16.mxu0 %v1965_v6  ;;  %v2017_v6 = vpack.c.bf16 %v357_v1, %v356_v0  ;;  %v68_v0 = vld [vmem:[#allocation2 + $0x80] sm:$0xff] }
  0xb5   :  { %1996 = vmatpush3.bf16.msra.mxu1 %v1995_v5  ;;  %v2047_v5 = vpack.c.bf16 %v371_v63, %v370_v61  ;;  %v415_v61 = vld [vmem:[#allocation5 + $0xa98] sm:$0xff] }
  0xb6   :  { %1998 = vmatprep.subr.bf16.mxu1 %v1997_v10  ;;  %v2049_v10 = vpack.c.bf16 %v389_v3, %v388_v2  ;;  %v447_v63 = vld [vmem:[#allocation5 + $0xb98] sm:$0xff]  ;;  %v70_v2 = vld [vmem:[#allocation2 + $0x90] sm:$0xff] }
  0xb7   :  { %1968 = vmatpush3.bf16.msra.mxu0 %v1967_v16  ;;  %v2019_v16 = vpack.c.bf16 %v341_v8, %v340_v7  ;;  %v430_v7 = vld [vmem:[#allocation5 + $0xb10] sm:$0xff] }
  0xb8   :  { %2002 = vmatprep.subr.bf16.mxu0 %v2001_v18  ;;  %v2021_v18 = vpack.c.bf16 %v359_v13, %v358_v12  ;;  %v448_v12 = vld [vmem:[#allocation5 + $0xba0] sm:$0xff]  ;;  %v449_v13 = vld [vmem:[#allocation5 + $0xba8] sm:$0xff] }
  0xb9   :  { %2000 = vmatpush3.bf16.msra.mxu1 %v1999_v17  ;;  %v2051_v17 = vpack.c.bf16 %v373_v11, %v372_v9  ;;  %v431_v9 = vld [vmem:[#allocation5 + $0xb18] sm:$0xff]  ;;  %v417_v11 = vld [vmem:[#allocation5 + $0xaa8] sm:$0xff] }
  0xba   :  { %2034 = vmatprep.subr.bf16.mxu1 %v2033_v22  ;;  %952 = vmatmul.mubr.f32.vlgmr.msra.gmra.mrb[6].mxu0 %v64_v28  ;;  %v2053_v22 = vpack.c.bf16 %v391_v15, %v390_v14  ;;  %v2023_v28 = vpack.c.bf16 %v343_v20, %v342_v19  ;;  %v73_v14 = vld [vmem:[#allocation2 + $0xa8] sm:$0xff]  ;;  %v400_v19 = vld [vmem:[#allocation5 + $0xa20] sm:$0xff] }
  0xbb   :  { %2004 = vmatpush3.bf16.msra.mxu0 %v2003_v29  ;;  %1091 = vmatprep.mubr.f32.mxu0 %v69_v42  ;;  %v2055_v29 = vpack.c.bf16 %v375_v23, %v374_v21  ;;  %v401_v20 = vld [vmem:[#allocation5 + $0xa28] sm:$0xff]  ;;  %v432_v21 = vld [vmem:[#allocation5 + $0xb20] sm:$0xff] }
  0xbc   :  { %1022 = vmatmul.mubr.f32.vlgmr.msra.gmra.mrb[6].mxu1 %v66_v30  ;;  %2006 = vmatprep.subr.bf16.mxu0 %v2005_v32  ;;  %v2025_v30 = vpack.c.bf16 %v361_v25, %v360_v24  ;;  %v345_v32 = vld [vmem:[#allocation5 + $0x868] sm:$0xff]  ;;  %v418_v24 = vld [vmem:[#allocation5 + $0xab0] sm:$0xff]  ;;  %v419_v25 = vld [vmem:[#allocation5 + $0xab8] sm:$0xff] }
  0xbd   :  { %2036 = vmatpush3.bf16.msra.mxu1 %v2035_v31  ;;  %1161 = vmatprep.mubr.f32.mxu1 %v71_v44  ;;  %v344_v31 = vld [vmem:[#allocation5 + $0x860] sm:$0xff]  ;;  %v347_v44 = vld [vmem:[#allocation5 + $0x878] sm:$0xff]  ;;  %v433_v23 = vld [vmem:[#allocation5 + $0xb28] sm:$0xff] }
  0xbe   :  { %2038 = vmatprep.subr.bf16.mxu1 %v2037_v36  ;;  %v362_v36 = vld [vmem:[#allocation5 + $0x8f0] sm:$0xff]  ;;  %v2027_v40 = vpack.c.bf16 %v345_v32, %v344_v31  ;;  %v403_v32 = vld [vmem:[#allocation5 + $0xa38] sm:$0xff] }
  0xbf   :  { %2008 = vmatpush3.bf16.msra.mxu0 %v2007_v43  ;;  %v2029_v42 = vpack.c.bf16 %v363_v37, %v362_v36  ;;  %v346_v43 = vld [vmem:[#allocation5 + $0x870] sm:$0xff]  ;;  %v420_v36 = vld [vmem:[#allocation5 + $0xac0] sm:$0xff]  ;;  %v421_v37 = vld [vmem:[#allocation5 + $0xac8] sm:$0xff] }
  0xc0   :  { %2010 = vmatprep.subr.bf16.mxu0 %v2009_v46  ;;  %v2061_v46 = vpack.c.bf16 %v395_v39, %v394_v38  ;;  %v2031_v52 = vpack.c.bf16 %v347_v44, %v346_v43  ;;  %v402_v31 = vld [vmem:[#allocation5 + $0xa30] sm:$0xff]  ;;  %v452_v38 = vld [vmem:[#allocation5 + $0xbc0] sm:$0xff]  ;;  %v453_v39 = vld [vmem:[#allocation5 + $0xbc8] sm:$0xff] }
  0xc1   :  { %2040 = vmatpush3.bf16.msra.mxu1 %v2039_v45  ;;  %v378_v45 = vld [vmem:[#allocation5 + $0x970] sm:$0xff]  ;;  %v404_v43 = vld [vmem:[#allocation5 + $0xa40] sm:$0xff]  ;;  %v405_v44 = vld [vmem:[#allocation5 + $0xa48] sm:$0xff] }
  0xc2   :  { %2042 = vmatprep.subr.bf16.mxu1 %v2041_v50  ;;  %v444_v50 = vld [vmem:[#allocation5 + $0xb80] sm:$0xff]  ;;  %v2063_v53 = vpack.c.bf16 %v379_v47, %v378_v45  ;;  %v437_v47 = vld [vmem:[#allocation5 + $0xb48] sm:$0xff] }
  0xc3   :  { %2012 = vmatpush3.bf16.msra.mxu0 %v2011_v56  ;;  %v397_v56 = vld [vmem:[#allocation5 + $0xa08] sm:$0xff]  ;;  %v436_v45 = vld [vmem:[#allocation5 + $0xb40] sm:$0xff] }
  0xc4   :  { %2014 = vmatprep.subr.bf16.mxu0 %v2013_v58  ;;  %v2097_v58 = vpack.c.bf16 %v445_v51, %v444_v50  ;;  %v2067_v1 = vpack.c.bf16 %v397_v56, %v396_v55  ;;  %v454_v50 = vld [vmem:[#allocation5 + $0xbd0] sm:$0xff]  ;;  %v455_v51 = vld [vmem:[#allocation5 + $0xbd8] sm:$0xff] }
  0xc5   :  { %2044 = vmatpush3.bf16.msra.mxu1 %v2043_v57  ;;  %v428_v57 = vld [vmem:[#allocation5 + $0xb00] sm:$0xff]  ;;  %v406_v55 = vld [vmem:[#allocation5 + $0xa50] sm:$0xff]  ;;  %v407_v56 = vld [vmem:[#allocation5 + $0xa58] sm:$0xff] }
  0xc6   :  { %2046 = vmatprep.subr.bf16.mxu1 %v2045_v62  ;;  %v446_v62 = vld [vmem:[#allocation5 + $0xb90] sm:$0xff]  ;;  %v2099_v3 = vpack.c.bf16 %v429_v59, %v428_v57  ;;  %v439_v59 = vld [vmem:[#allocation5 + $0xb58] sm:$0xff] }
  0xc7   :  { %2016 = vmatpush3.bf16.msra.mxu0 %v2015_v4  ;;  %v2069_v4 = vpack.c.bf16 %v415_v61, %v414_v60  ;;  %v2101_v8 = vpack.c.bf16 %v447_v63, %v446_v62  ;;  %v438_v57 = vld [vmem:[#allocation5 + $0xb50] sm:$0xff]  ;;  %v424_v60 = vld [vmem:[#allocation5 + $0xae0] sm:$0xff]  ;;  %v425_v61 = vld [vmem:[#allocation5 + $0xae8] sm:$0xff] }
  0xc8   :  { %2018 = vmatprep.subr.bf16.mxu0 %v2017_v6  ;;  %v399_v6 = vld [vmem:[#allocation5 + $0xa18] sm:$0xff]  ;;  %v456_v62 = vld [vmem:[#allocation5 + $0xbe0] sm:$0xff]  ;;  %v457_v63 = vld [vmem:[#allocation5 + $0xbe8] sm:$0xff] }
  0xc9   :  { %2048 = vmatpush3.bf16.msra.mxu1 %v2047_v5  ;;  %v398_v5 = vld [vmem:[#allocation5 + $0xa10] sm:$0xff] }
  0xca   :  { %2050 = vmatprep.subr.bf16.mxu1 %v2049_v10  ;;  %v416_v10 = vld [vmem:[#allocation5 + $0xaa0] sm:$0xff]  ;;  %v2071_v15 = vpack.c.bf16 %v399_v6, %v398_v5  ;;  %v2121_v6 = vpack.c.bf16 %v457_v63, %v456_v62 }
  0xcb   :  { %2020 = vmatpush3.bf16.msra.mxu0 %v2019_v16  ;;  %v75_v16 = vld [vmem:[#allocation2 + $0xb8] sm:$0xff]  ;;  %v440_v5 = vld [vmem:[#allocation5 + $0xb60] sm:$0xff] }
  0xcc   :  { %2022 = vmatprep.subr.bf16.mxu0 %v2021_v18  ;;  %v2073_v18 = vpack.c.bf16 %v417_v11, %v416_v10  ;;  %v458_v10 = vld [vmem:[#allocation5 + $0xbf0] sm:$0xff]  ;;  %v459_v11 = vld [vmem:[#allocation5 + $0xbf8] sm:$0xff] }
  0xcd   :  { %2052 = vmatpush3.bf16.msra.mxu1 %v2051_v17  ;;  %v2103_v17 = vpack.c.bf16 %v431_v9, %v430_v7  ;;  %v441_v7 = vld [vmem:[#allocation5 + $0xb68] sm:$0xff]  ;;  %v427_v9 = vld [vmem:[#allocation5 + $0xaf8] sm:$0xff] }
  0xce   :  { %2054 = vmatprep.subr.bf16.mxu1 %v2053_v22  ;;  %v2105_v22 = vpack.c.bf16 %v449_v13, %v448_v12  ;;  %v2123_v13 = vpack.c.bf16 %v441_v7, %v440_v5 }
  0xcf   :  { %2024 = vmatpush3.bf16.msra.mxu0 %v2023_v28  ;;  %v2075_v28 = vpack.c.bf16 %v401_v20, %v400_v19  ;;  %v443_v19 = vld [vmem:[#allocation5 + $0xb78] sm:$0xff] }
  0xd0   :  { %2026 = vmatprep.subr.bf16.mxu0 %v2025_v30  ;;  %v2077_v30 = vpack.c.bf16 %v419_v25, %v418_v24  ;;  %v1324_v25 = vld [vmem:[#allocation7] ss:$0 sm:$0xff] }
  0xd1   :  { %2056 = vmatpush3.bf16.msra.mxu1 %v2055_v29  ;;  %v2107_v29 = vpack.c.bf16 %v433_v23, %v432_v21  ;;  %v74_v23 = vld [vmem:[#allocation2 + $0xb0] sm:$0xff] }
  0xd2   :  { %2058 = vmatprep.subr.bf16.mxu1 %v2057_v34  ;;  %v2109_v34 = vpack.c.bf16 %v451_v27, %v450_v26 }
  0xd3   :  { %2028 = vmatpush3.bf16.msra.mxu0 %v2027_v40  ;;  %v2079_v40 = vpack.c.bf16 %v403_v32, %v402_v31 }
  0xd4   :  { %2030 = vmatprep.subr.bf16.mxu0 %v2029_v42  ;;  %v2081_v42 = vpack.c.bf16 %v421_v37, %v420_v36 }
  0xd5   :  { %2060 = vmatpush3.bf16.msra.mxu1 %v2059_v41  ;;  %v2111_v41 = vpack.c.bf16 %v435_v35, %v434_v33 }
  0xd6   :  { %2062 = vmatprep.subr.bf16.mxu1 %v2061_v46  ;;  %v2113_v46 = vpack.c.bf16 %v453_v39, %v452_v38 }
  0xd7   :  { %2032 = vmatpush3.bf16.msra.mxu0 %v2031_v52  ;;  %v2083_v52 = vpack.c.bf16 %v405_v44, %v404_v43 }
  0xd8   :  { %2066 = vmatprep.subr.bf16.mxu0 %v2065_v54  ;;  %v2085_v54 = vpack.c.bf16 %v423_v49, %v422_v48 }
  0xd9   :  { %2064 = vmatpush3.bf16.msra.mxu1 %v2063_v53  ;;  %v2115_v53 = vpack.c.bf16 %v437_v47, %v436_v45 }
  0xda   :  { %2098 = vmatprep.subr.bf16.mxu1 %v2097_v58  ;;  %1092 = vmatmul.mubr.f32.vlgmr.msra.gmra.mrb[8].mxu0 %v68_v0  ;;  %v2117_v58 = vpack.c.bf16 %v455_v51, %v454_v50  ;;  %v2087_v0 = vpack.c.bf16 %v407_v56, %v406_v55 }
  0xdb   :  { %2068 = vmatpush3.bf16.msra.mxu0 %v2067_v1  ;;  %1231 = vmatprep.mubr.f32.mxu0 %v73_v14  ;;  %v2119_v1 = vpack.c.bf16 %v439_v59, %v438_v57 }
  0xdc   :  { %1162 = vmatmul.mubr.f32.vlgmr.msra.gmra.mrb[8].mxu1 %v70_v2  ;;  %2070 = vmatprep.subr.bf16.mxu0 %v2069_v4  ;;  %v2089_v2 = vpack.c.bf16 %v425_v61, %v424_v60  ;;  %v409_v4 = vld [vmem:[#allocation5 + $0xa68] sm:$0xff] }
  0xdd   :  { %2100 = vmatpush3.bf16.msra.mxu1 %v2099_v3  ;;  %1301 = vmatprep.mubr.f32.mxu1 %v75_v16  ;;  %v408_v3 = vld [vmem:[#allocation5 + $0xa60] sm:$0xff]  ;;  %v411_v16 = vld [vmem:[#allocation5 + $0xa78] sm:$0xff] }
  0xde   :  { %2102 = vmatprep.subr.bf16.mxu1 %v2101_v8  ;;  %v426_v8 = vld [vmem:[#allocation5 + $0xaf0] sm:$0xff]  ;;  %v2091_v12 = vpack.c.bf16 %v409_v4, %v408_v3 }
  0xdf   :  { %2072 = vmatpush3.bf16.msra.mxu0 %v2071_v15  ;;  %v2093_v14 = vpack.c.bf16 %v427_v9, %v426_v8  ;;  %v410_v15 = vld [vmem:[#allocation5 + $0xa70] sm:$0xff] }
  0xe0   :  { %2074 = vmatprep.subr.bf16.mxu0 %v2073_v18  ;;  %v442_v18 = vld [vmem:[#allocation5 + $0xb70] sm:$0xff]  ;;  %v2095_v20 = vpack.c.bf16 %v411_v16, %v410_v15 }
  0xe1   :  { %2104 = vmatpush3.bf16.msra.mxu1 %v2103_v17  ;;  %v2125_v17 = vpack.c.bf16 %v459_v11, %v458_v10  ;;  %v2127_v21 = vpack.c.bf16 %v443_v19, %v442_v18 }
  0xe2   :  { %2106 = vmatprep.subr.bf16.mxu1 %v2105_v22  ;;  %v72_v22 = vld [vmem:[#allocation2 + $0xa0] sm:$0xff] }
  0xe3   :  { %2076 = vmatpush3.bf16.msra.mxu0 %v2075_v28 }
  0xe4   :  { %2078 = vmatprep.subr.bf16.mxu0 %v2077_v30 }
  0xe5   :  { %2108 = vmatpush3.bf16.msra.mxu1 %v2107_v29 }
  0xe6   :  { %2110 = vmatprep.subr.bf16.mxu1 %v2109_v34 }
  0xe7   :  { %2080 = vmatpush3.bf16.msra.mxu0 %v2079_v40 }
  0xe8   :  { %2082 = vmatprep.subr.bf16.mxu0 %v2081_v42 }
  0xe9   :  { %2112 = vmatpush3.bf16.msra.mxu1 %v2111_v41 }
  0xea   :  { %2114 = vmatprep.subr.bf16.mxu1 %v2113_v46 }
  0xeb   :  { %2084 = vmatpush3.bf16.msra.mxu0 %v2083_v52 }
  0xec   :  { %2086 = vmatprep.subr.bf16.mxu0 %v2085_v54 }
  0xed   :  { %2116 = vmatpush3.bf16.msra.mxu1 %v2115_v53 }
  0xee   :  { %2118 = vmatprep.subr.bf16.mxu1 %v2117_v58 }
  0xef   :  { %2088 = vmatpush3.bf16.msra.mxu0 %v2087_v0 }
  0xf0   :  { %2090 = vmatprep.subr.bf16.mxu0 %v2089_v2 }
  0xf1   :  { %2120 = vmatpush3.bf16.msra.mxu1 %v2119_v1 }
  0xf2   :  { %2122 = vmatprep.subr.bf16.mxu1 %v2121_v6 }
  0xf3   :  { %2092 = vmatpush3.bf16.msra.mxu0 %v2091_v12 }
  0xf4   :  { %2094 = vmatprep.subr.bf16.mxu0 %v2093_v14 }
  0xf5   :  { %2124 = vmatpush3.bf16.msra.mxu1 %v2123_v13 }
  0xf6   :  { %2126 = vmatprep.subr.bf16.mxu1 %v2125_v17 }
  0xf7   :  { %2096 = vmatpush3.bf16.msra.mxu0 %v2095_v20 }
  0xf9   :  { %2128 = vmatpush3.bf16.msra.mxu1 %v2127_v21 }
  0xfa   :  { %1232 = vmatmul.mubr.f32.vlgmr.msra.gmra.mrb[10].mxu0 %v72_v22 }
  0xfc   :  { %1302 = vmatmul.mubr.f32.vlgmr.msra.gmra.mrb[10].mxu1 %v74_v23 }
 0x12d   :  { %v1357_v24 = vpop.f32.mrb[0].mxu0 }
 0x12e   :  { %v1358_v26 = vpop.f32.mrb[1].mxu0 }
 0x12f   :  { %v1392_v27 = vpop.f32.mrb[0].mxu1  ;;  %v1359_v28 = vadd.f32 %v1358_v26, %v1357_v24 }
 0x130   :  { %v1393_v29 = vpop.f32.mrb[1].mxu1 }
 0x131   :  { %v1394_v30 = vadd.f32 %v1393_v29, %v1392_v27  ;;  %v534_v31 = vadd.f32 %v1359_v28, %v1324_v25 }
 0x133   :  { %v604_v32 = vadd.f32 %v1394_v30, %v534_v31 }
 0x14d   :  { %v1427_v33 = vpop.f32.mrb[2].mxu0 }
 0x14e   :  { %v1428_v34 = vpop.f32.mrb[3].mxu0 }
 0x14f   :  { %v1462_v35 = vpop.f32.mrb[2].mxu1  ;;  %v1429_v36 = vadd.f32 %v1428_v34, %v1427_v33 }
 0x150   :  { %v1463_v37 = vpop.f32.mrb[3].mxu1 }
 0x151   :  { %v1464_v38 = vadd.f32 %v1463_v37, %v1462_v35  ;;  %v674_v39 = vadd.f32 %v1429_v36, %v604_v32 }
 0x153   :  { %v744_v40 = vadd.f32 %v1464_v38, %v674_v39 }
 0x16d   :  { %v1497_v41 = vpop.f32.mrb[4].mxu0 }
 0x16e   :  { %v1498_v42 = vpop.f32.mrb[5].mxu0 }
 0x16f   :  { %v1532_v43 = vpop.f32.mrb[4].mxu1  ;;  %v1499_v44 = vadd.f32 %v1498_v42, %v1497_v41 }
 0x170   :  { %v1533_v45 = vpop.f32.mrb[5].mxu1 }
 0x171   :  { %v1534_v46 = vadd.f32 %v1533_v45, %v1532_v43  ;;  %v814_v47 = vadd.f32 %v1499_v44, %v744_v40 }
 0x173   :  { %v884_v48 = vadd.f32 %v1534_v46, %v814_v47 }
 0x18d   :  { %v1567_v49 = vpop.f32.mrb[6].mxu0 }
 0x18e   :  { %v1568_v50 = vpop.f32.mrb[7].mxu0 }
 0x18f   :  { %v1602_v51 = vpop.f32.mrb[6].mxu1  ;;  %v1569_v52 = vadd.f32 %v1568_v50, %v1567_v49 }
 0x190   :  { %v1603_v53 = vpop.f32.mrb[7].mxu1 }
 0x191   :  { %v1604_v54 = vadd.f32 %v1603_v53, %v1602_v51  ;;  %v954_v55 = vadd.f32 %v1569_v52, %v884_v48 }
 0x193   :  { %v1024_v56 = vadd.f32 %v1604_v54, %v954_v55 }
 0x1ad   :  { %v1637_v57 = vpop.f32.mrb[8].mxu0 }
 0x1ae   :  { %v1638_v58 = vpop.f32.mrb[9].mxu0 }
 0x1af   :  { %v1672_v59 = vpop.f32.mrb[8].mxu1  ;;  %v1639_v60 = vadd.f32 %v1638_v58, %v1637_v57 }
 0x1b0   :  { %v1673_v61 = vpop.f32.mrb[9].mxu1 }
 0x1b1   :  { %v1674_v62 = vadd.f32 %v1673_v61, %v1672_v59  ;;  %v1094_v63 = vadd.f32 %v1639_v60, %v1024_v56 }
 0x1b3   :  { %v1164_v0 = vadd.f32 %v1674_v62, %v1094_v63 }
 0x1cd   :  { %v1707_v1 = vpop.f32.mrb[10].mxu0 }
 0x1ce   :  { %v1708_v2 = vpop.f32.mrb[11].mxu0 }
 0x1cf   :  { %v1742_v3 = vpop.f32.mrb[10].mxu1  ;;  %v1709_v4 = vadd.f32 %v1708_v2, %v1707_v1 }
 0x1d0   :  { %v1743_v5 = vpop.f32.mrb[11].mxu1 }
 0x1d1   :  { %v1744_v6 = vadd.f32 %v1743_v5, %v1742_v3  ;;  %v1234_v7 = vadd.f32 %v1709_v4, %v1164_v0 }
 0x1d3   :  { %v1304_v8 = vadd.f32 %v1744_v6, %v1234_v7 }
 0x1d5   :  { %1307 = vst [vmem:[#allocation8] sm:$0xff] %v1304_v8 }
 0x1d6   :  { %2212 = shalt.err (!%p2209_p0)
}
 0x1d7   :  { %s2213_s26 = scalar_lea.hbm %s2306_s3, 128 }
 0x1d8   :  { %p2214_p1 = scmp.ne.s32.totalorder %s2306_s3, %s2213_s26  ;;  %p2217_p2 = scmp.lt.u32.totalorder %s2213_s26, %s2306_s3 }
 0x1da   :  { %p2219_p3 = pnand %p2217_p2, %p2214_p1 }
 0x1dc   :  { %2222 = shalt.err (!%p2219_p3)
}
 0x1dd   :  { %1317 = dma.vmem_to_hbm [thread:$0]  %s1315_s22, 128, %s2306_s3, [#allocation4]  }
 0x1de   :  { %2227 = dma.done.wait [#allocation4], 128  }
 0x1df   :  { %2228 = vsyncadd [#allocation4], 4294967168 }
 0x1e0   :  { %1321 = vsyncpa [#allocation3], 1 }
 0x1e1   :  { %1322 = vsyncpa [#allocation6], 1 }
 0x1e2   :  { %1323 = vsyncpa [#allocation4], 1 }

</bundles_post_ra>
